<compile_context>
chip_gen: v6e
topology: v6e:2x2x1
jax: 0.10.0
libtpu: 0.0.40
codegen_flags: <defaults>
</compile_context>

<pallas_src>
import functools
import math

import jax
import jax.numpy as jnp
from jax.experimental import pallas as pl
from jax.experimental.pallas import tpu as pltpu

LN_EPS = 1e-12          # HF BERT LayerNorm eps
NEG_BIAS = -1e9         # finite additive mask (safe under bf16/f32 mixed math)


def _device_kind():
    try:
        return jax.devices()[0].device_kind.lower()
    except Exception:
        return ""


_KIND = _device_kind()
_IS_V5 = "v5" in _KIND
_IS_V6 = "v6" in _KIND

# Scoped VMEM: generous on 128-MiB parts (v5e/v6e), conservative otherwise
# (v7x has only 64 MiB physical VMEM per TensorCore).
VMEM_LIMIT = (96 if (_IS_V5 or _IS_V6) else 48) * 1024 * 1024
# Weight-stream arithmetic intensity of the GEMM kernel is exactly tm
# FLOPs/byte; v6e needs ~650 to be MXU-bound, v5e/v7x ~240-310.
TM_TARGET = 1024 if _IS_V6 else 512
TN_TARGET = 1024
TK_TARGET = 2048        # full K for H=1024 contractions, half K for 4096
# bf16 EUP exp exists on v6e/v7x; v5e EUP has no bf16 path.
BF16_EXP = not _IS_V5


# ------------------------------ helpers ------------------------------------

def _tile(dim, target, align):
    """Largest `align`-multiple tile <= target that divides dim (else full)."""
    if dim <= target:
        return dim
    t = (target // align) * align
    while t >= align:
        if dim % t == 0:
            return t
        t -= align
    return dim


# --------------------------- tiled linear kernel ----------------------------

def _mm_kernel(*refs, act, fuse_ln):
    # y = x @ w + b, optional activation, optional fused (residual + LayerNorm)
    # epilogue. Matmul operands are bf16, accumulation + epilogue math in f32.
    if fuse_ln:
        x_ref, w_ref, b_ref, r_ref, g_ref, bb_ref, o_ref, acc_ref = refs
    else:
        x_ref, w_ref, b_ref, o_ref, acc_ref = refs

    k = pl.program_id(2)

    @pl.when(k == 0)
    def _():
        acc_ref[...] = jnp.zeros_like(acc_ref)

    acc_ref[...] += jnp.dot(x_ref[...], w_ref[...],
                            preferred_element_type=jnp.float32)

    @pl.when(k == pl.num_programs(2) - 1)
    def _():
        y = acc_ref[...] + b_ref[...].astype(jnp.float32)
        if act == "gelu":
            # tanh-approximation GELU: tanh goes to the EUP (free slot) instead
            # of ~15 VALU ops/elem for the erf polynomial. ~1e-3-level
            # deviation from HF's exact erf GELU (acceptable for inference).
            c = 0.7978845608028654  # sqrt(2/pi)
            y = 0.5 * y * (1.0 + jnp.tanh(c * (y + 0.044715 * y * y * y)))
        elif act == "tanh":    # BertPooler activation
            y = jnp.tanh(y)
        if fuse_ln:            # LayerNorm(y + residual), eps=1e-12, all in f32
            y = y + r_ref[...].astype(jnp.float32)
            mu = jnp.mean(y, axis=-1, keepdims=True)
            yc = y - mu
            var = jnp.mean(yc * yc, axis=-1, keepdims=True)
            y = (yc * jax.lax.rsqrt(var + LN_EPS)
                 * g_ref[...].astype(jnp.float32)
                 + bb_ref[...].astype(jnp.float32))
        o_ref[...] = y.astype(o_ref.dtype)


def tiled_linear(x, w, b, *, act=None, residual=None, ln=None,
                 out_dtype=jnp.bfloat16, tm_target=None, tn_target=None,
                 tk_target=None):
    """y = act(x @ w + b), optionally followed by LayerNorm(y + residual)."""
    tm_target = TM_TARGET if tm_target is None else tm_target
    tn_target = TN_TARGET if tn_target is None else tn_target
    tk_target = TK_TARGET if tk_target is None else tk_target
    M, K = x.shape
    _, N = w.shape
    fuse_ln = ln is not None
    x = x.astype(w.dtype)

    tm = _tile(M, tm_target, 8)
    tk = _tile(K, tk_target, 128)
    tn = N if fuse_ln else _tile(N, tn_target, 128)  # LN needs full row in-tile
    grid = (M // tm, N // tn, K // tk)

    in_specs = [
        pl.BlockSpec((tm, tk), lambda i, j, k: (i, k)),
        pl.BlockSpec((tk, tn), lambda i, j, k: (k, j)),
        pl.BlockSpec((1, tn), lambda i, j, k: (0, j)),
    ]
    args = [x, w, b.reshape(1, N)]
    if fuse_ln:
        gamma, beta = ln
        in_specs += [
            pl.BlockSpec((tm, tn), lambda i, j, k: (i, j)),
            pl.BlockSpec((1, tn), lambda i, j, k: (0, j)),
            pl.BlockSpec((1, tn), lambda i, j, k: (0, j)),
        ]
        args += [residual, gamma.reshape(1, N), beta.reshape(1, N)]

    return pl.pallas_call(
        functools.partial(_mm_kernel, act=act, fuse_ln=fuse_ln),
        out_shape=jax.ShapeDtypeStruct((M, N), out_dtype),
        grid_spec=pltpu.PrefetchScalarGridSpec(
            num_scalar_prefetch=0,
            grid=grid,
            in_specs=in_specs,
            out_specs=pl.BlockSpec((tm, tn), lambda i, j, k: (i, j)),
            scratch_shapes=[pltpu.VMEM((tm, tn), jnp.float32)]),
        compiler_params=pltpu.CompilerParams(
            dimension_semantics=("parallel", "parallel", "arbitrary"),
            vmem_limit_bytes=VMEM_LIMIT),
    )(*args)


# --------------------------- embedding LayerNorm ----------------------------
# TODO(synk): could be fused as a prologue into the first layer's QKV matmul
# to save one [M, H] HBM round trip (low priority: one pass vs. 24 layers).

def _ln_kernel(x_ref, g_ref, b_ref, o_ref):
    x = x_ref[...].astype(jnp.float32)
    mu = jnp.mean(x, axis=-1, keepdims=True)
    xc = x - mu
    var = jnp.mean(xc * xc, axis=-1, keepdims=True)
    o_ref[...] = (xc * jax.lax.rsqrt(var + LN_EPS) * g_ref[...]
                  + b_ref[...]).astype(o_ref.dtype)


def layernorm(x, gamma, beta, *, out_dtype=jnp.bfloat16, tm_target=512):
    M, H = x.shape
    tm = _tile(M, tm_target, 8)
    return pl.pallas_call(
        _ln_kernel,
        grid=(M // tm,),
        in_specs=[pl.BlockSpec((tm, H), lambda i: (i, 0)),
                  pl.BlockSpec((1, H), lambda i: (0, 0)),
                  pl.BlockSpec((1, H), lambda i: (0, 0))],
        out_specs=pl.BlockSpec((tm, H), lambda i: (i, 0)),
        out_shape=jax.ShapeDtypeStruct((M, H), out_dtype),
        compiler_params=pltpu.CompilerParams(
            dimension_semantics=("parallel",),
            vmem_limit_bytes=VMEM_LIMIT),
    )(x, gamma.reshape(1, H), beta.reshape(1, H))


# ------------------------------- attention ----------------------------------

def pack_qkv(wq, wk, wv, bq, bk, bv, n_heads):
    """Fuse the Q/K/V projections into one [H, 3H] weight whose OUTPUT columns
    are grouped per head-PAIR as [Q_h0 Q_h1 | K_h0 K_h1 | V_h0 V_h1 | Q_h2 ...].
    Each pair window is 6*d_head lanes (384 for d_head=64, a multiple of 128),
    so the attention kernel's per-pair BlockSpec slice is lane-aligned.  This
    permutation is a one-time weight-prep step (free at inference)."""
    hin, hout = wq.shape
    assert n_heads % 2 == 0, "head-pair packing needs an even head count"
    p = n_heads // 2
    td = 2 * (hout // n_heads)
    w = jnp.stack([wq.reshape(hin, p, td),
                   wk.reshape(hin, p, td),
                   wv.reshape(hin, p, td)], axis=2).reshape(hin, 3 * hout)
    b = jnp.stack([bq.reshape(p, td),
                   bk.reshape(p, td),
                   bv.reshape(p, td)], axis=1).reshape(3 * hout)
    return w, b


def _attn_pair_kernel(qkv_ref, bias_ref, o_ref, *, d_head, scale, bf16_exp):
    # One (batch, head-pair) per grid step: the packed (S, 6*d_head) window
    # holds [Q_h0 Q_h1 K_h0 K_h1 V_h0 V_h1].  Context for the two heads is
    # concatenated into one lane-dense (S, 2*d_head) = (S, 128) store, already
    # in the [B, S, H] layout the Wo matmul consumes (no transposes anywhere).
    # TODO(synk): for very long sequences, tile over key blocks with online
    # softmax instead of materializing the full (S, S) score matrix.
    bias = bias_ref[0]                       # (1, S) f32, masks keys only
    ctx_pair = []
    for h in range(2):                       # 2-wide static unroll (bounded)
        q = qkv_ref[0, :, h * d_head:(h + 1) * d_head]
        k = qkv_ref[0, :, (2 + h) * d_head:(3 + h) * d_head]
        v = qkv_ref[0, :, (4 + h) * d_head:(5 + h) * d_head]
        # q @ k^T without materializing a transpose; accumulate in f32.
        s = jax.lax.dot_general(q, k, (((1,), (1,)), ((), ())),
                                preferred_element_type=jnp.float32)
        s = s * scale + bias                 # HF semantics: mask keys only;
        #                                    # padded-query rows unused downstream.
        s = s - jnp.max(s, axis=-1, keepdims=True)
        if bf16_exp:                         # bf16 EUP exp (v6e/v7x): ~2x EUP tput
            p = jnp.exp(s.astype(jnp.bfloat16))
            l = jnp.sum(p.astype(jnp.float32), axis=-1, keepdims=True)
        else:                                # v5e: f32 exp (no bf16 EUP path)
            p = jnp.exp(s)
            l = jnp.sum(p, axis=-1, keepdims=True)
        inv = pl.reciprocal(l, approx=True)  # EUP, not VALU
        ctx = jnp.dot(p.astype(v.dtype), v, preferred_element_type=jnp.float32)
        ctx_pair.append((ctx * inv).astype(o_ref.dtype))
    o_ref[0] = jnp.concatenate(ctx_pair, axis=-1)   # single 128-lane-wide store


def sdpa(qkv_packed, mask_bias, *, n_heads):
    B, S, H3 = qkv_packed.shape
    H = H3 // 3
    d_head = H // n_heads
    assert n_heads % 2 == 0
    n_pairs = n_heads // 2
    pair_w = 6 * d_head                      # 384 lanes for d_head=64
    scale = 1.0 / math.sqrt(d_head)
    return pl.pallas_call(
        functools.partial(_attn_pair_kernel, d_head=d_head, scale=scale,
                          bf16_exp=BF16_EXP),
        grid=(B, n_pairs),
        in_specs=[pl.BlockSpec((1, S, pair_w), lambda b, j: (b, 0, j)),
                  pl.BlockSpec((1, 1, S), lambda b, j: (b, 0, 0))],
        out_specs=pl.BlockSpec((1, S, 2 * d_head), lambda b, j: (b, 0, j)),
        out_shape=jax.ShapeDtypeStruct((B, S, H), jnp.bfloat16),
        compiler_params=pltpu.CompilerParams(
            # Distinct output block per (b, j): both axes parallel -> megacore
            # shards attention over B * n_heads/2 blocks (matters on v7x).
            dimension_semantics=("parallel", "parallel"),
            vmem_limit_bytes=VMEM_LIMIT),
    )(qkv_packed, mask_bias)


# ----------------------------- parameters -----------------------------------

def init_params(key, *, vocab, max_pos, hidden, inter, layers, num_labels,
                n_heads):
    keys = iter(jax.random.split(key, 8 + 8 * layers))

    def nrm(shape, dtype=jnp.bfloat16, std=0.02):
        return (std * jax.random.normal(next(keys), shape,
                                        dtype=jnp.float32)).astype(dtype)

    def zeros(shape):
        return jnp.zeros(shape, jnp.float32)

    def ones(shape):
        return jnp.ones(shape, jnp.float32)

    params = {
        # Embedding tables stay f32 (gathered by host-side XLA, LN in f32).
        "word_emb": nrm((vocab, hidden), jnp.float32),
        "pos_emb": nrm((max_pos, hidden), jnp.float32),
        "type_emb": nrm((2, hidden), jnp.float32),
        "emb_ln_g": ones((hidden,)), "emb_ln_b": zeros((hidden,)),
        "layers": [],
        "pool_w": nrm((hidden, hidden)), "pool_b": zeros((hidden,)),
        "cls_w": nrm((hidden, num_labels)), "cls_b": zeros((num_labels,)),
    }
    for _ in range(layers):
        wq, wk, wv = (nrm((hidden, hidden)), nrm((hidden, hidden)),
                      nrm((hidden, hidden)))
        bq, bk, bv = zeros((hidden,)), zeros((hidden,)), zeros((hidden,))
        w_qkv, b_qkv = pack_qkv(wq, wk, wv, bq, bk, bv, n_heads)
        params["layers"].append({
            "w_qkv": w_qkv, "b_qkv": b_qkv,          # head-pair packed [H, 3H]
            "wo": nrm((hidden, hidden)), "bo": zeros((hidden,)),
            "ln1_g": ones((hidden,)), "ln1_b": zeros((hidden,)),
            "w1": nrm((hidden, inter)), "b1": zeros((inter,)),
            "w2": nrm((inter, hidden)), "b2": zeros((hidden,)),
            "ln2_g": ones((hidden,)), "ln2_b": zeros((hidden,)),
        })
    return params


# ------------------------------- forward ------------------------------------

def bert_forward(params, input_ids, attention_mask, *, n_heads):
    B, S = input_ids.shape
    H = params["word_emb"].shape[1]

    # Embeddings (table gathers are plain-JAX glue) + embedding LayerNorm.
    # TODO(synk): token_type_ids hard-coded to segment 0 (single-sequence task).
    emb = (params["word_emb"][input_ids]
           + params["pos_emb"][:S][None, :, :]
           + params["type_emb"][0][None, None, :])
    h = layernorm(emb.reshape(B * S, H),
                  params["emb_ln_g"], params["emb_ln_b"])        # [M, H] bf16

    # Additive attention-mask bias over keys (finite constant; HF-equivalent).
    mask_bias = ((1.0 - attention_mask.astype(jnp.float32))
                 * NEG_BIAS).reshape(B, 1, S)

    for layer in params["layers"]:
        # --- self attention ---
        qkv = tiled_linear(h, layer["w_qkv"], layer["b_qkv"])    # [M, 3H] packed
        ctx = sdpa(qkv.reshape(B, S, 3 * H), mask_bias, n_heads=n_heads)
        # output projection fused with bias + residual-add + LayerNorm
        # TODO(synk): hidden_dropout_prob dropout omitted (eval-mode identity).
        h = tiled_linear(ctx.reshape(B * S, H), layer["wo"], layer["bo"],
                         residual=h, ln=(layer["ln1_g"], layer["ln1_b"]))
        # --- feed forward ---
        inter = tiled_linear(h, layer["w1"], layer["b1"], act="gelu")
        h = tiled_linear(inter, layer["w2"], layer["b2"],
                         residual=h, ln=(layer["ln2_g"], layer["ln2_b"]))

    # Pooler (tanh dense on [CLS]) + classifier head -> logits.
    cls_tok = h.reshape(B, S, H)[:, 0, :]
    pooled = tiled_linear(cls_tok, params["pool_w"], params["pool_b"],
                          act="tanh")
    logits = tiled_linear(pooled, params["cls_w"], params["cls_b"],
                          out_dtype=jnp.float32)
    return logits


# --------------------------------- main --------------------------------------

if __name__ == "__main__":
    # Small synthetic config.  Real bert-large-portuguese-cased is H=1024,
    # L=24, 16 heads of d_head=64, I=4096; we keep d_head=64 here (2 heads,
    # H=128) so the head-pair packing / lane alignment mirrors the real model,
    # while the tiling helpers fall back to full-extent blocks at these sizes.
    B, S = 2, 8
    VOCAB, MAX_POS = 128, 16
    H, NH, INTER, LAYERS = 128, 2, 256, 2
    NUM_LABELS = 3  # feature_count

    key = jax.random.PRNGKey(0)
    k_param, k_ids = jax.random.split(key)

    params = init_params(k_param, vocab=VOCAB, max_pos=MAX_POS, hidden=H,
                         inter=INTER, layers=LAYERS, num_labels=NUM_LABELS,
                         n_heads=NH)

    input_ids = jax.random.randint(k_ids, (B, S), 0, VOCAB, dtype=jnp.int32)
    attention_mask = jnp.array([[1, 1, 1, 1, 1, 1, 1, 1],
                                [1, 1, 1, 1, 1, 1, 0, 0]], dtype=jnp.int32)

    fwd = jax.jit(functools.partial(bert_forward, n_heads=NH))
    logits = fwd(params, input_ids, attention_mask)
    jax.block_until_ready(logits)

    assert logits.shape == (B, NUM_LABELS) and logits.dtype == jnp.float32
    assert bool(jnp.all(jnp.isfinite(logits)))
    print("KERNEL_OK")
</pallas_src>

<mosaic_0001>
module attributes {stable_mosaic.version = 11 : i64} {
  func.func @_ln_kernel(%arg0: i32, %arg1: memref<16x128xf32, #tpu.memory_space<vmem>>, %arg2: memref<1x128xf32, #tpu.memory_space<vmem>>, %arg3: memref<1x128xf32, #tpu.memory_space<vmem>>, %arg4: memref<16x128xbf16, #tpu.memory_space<vmem>>) attributes {dimension_semantics = [#tpu.dimension_semantics<parallel>], iteration_bounds = array<i64: 1>, scalar_prefetch = 0 : i64, scratch_operands = 0 : i64, tpu.core_type = #tpu.core_type<tc>, window_params = [{transform_indices = @transform_0, window_bounds = array<i64: 16, 128>}, {pipeline_mode = #tpu.pipeline_mode<synchronous>, transform_indices = @transform_1, window_bounds = array<i64: 1, 128>}, {pipeline_mode = #tpu.pipeline_mode<synchronous>, transform_indices = @transform_2, window_bounds = array<i64: 1, 128>}, {transform_indices = @transform_3, window_bounds = array<i64: 16, 128>}]} {
    %c0 = arith.constant 0 : index
    %c0_0 = arith.constant 0 : index
    %0 = vector.load %arg1[%c0, %c0_0] : memref<16x128xf32, #tpu.memory_space<vmem>>, vector<16x128xf32>
    %cst = arith.constant dense<0.000000e+00> : vector<16xf32>
    %1 = vector.multi_reduction <add>, %0, %cst [1] : vector<16x128xf32> to vector<16xf32>
    %2 = vector.shape_cast %1 : vector<16xf32> to vector<16x1xf32>
    %cst_1 = arith.constant 1.280000e+02 : f32
    %3 = vector.broadcast %cst_1 : f32 to vector<16x1xf32>
    %4 = arith.divf %2, %3 : vector<16x1xf32>
    %5 = vector.broadcast %4 : vector<16x1xf32> to vector<16x128xf32>
    %6 = arith.subf %0, %5 : vector<16x128xf32>
    %7 = arith.mulf %6, %6 : vector<16x128xf32>
    %cst_2 = arith.constant dense<0.000000e+00> : vector<16xf32>
    %8 = vector.multi_reduction <add>, %7, %cst_2 [1] : vector<16x128xf32> to vector<16xf32>
    %9 = vector.shape_cast %8 : vector<16xf32> to vector<16x1xf32>
    %cst_3 = arith.constant 1.280000e+02 : f32
    %10 = vector.broadcast %cst_3 : f32 to vector<16x1xf32>
    %11 = arith.divf %9, %10 : vector<16x1xf32>
    %cst_4 = arith.constant 9.99999996E-13 : f32
    %12 = vector.broadcast %cst_4 : f32 to vector<16x1xf32>
    %13 = arith.addf %11, %12 : vector<16x1xf32>
    %14 = math.rsqrt %13 : vector<16x1xf32>
    %15 = vector.broadcast %14 : vector<16x1xf32> to vector<16x128xf32>
    %16 = arith.mulf %6, %15 : vector<16x128xf32>
    %c0_5 = arith.constant 0 : index
    %c0_6 = arith.constant 0 : index
    %17 = vector.load %arg2[%c0_5, %c0_6] : memref<1x128xf32, #tpu.memory_space<vmem>>, vector<1x128xf32>
    %18 = vector.broadcast %17 : vector<1x128xf32> to vector<16x128xf32>
    %19 = arith.mulf %16, %18 : vector<16x128xf32>
    %c0_7 = arith.constant 0 : index
    %c0_8 = arith.constant 0 : index
    %20 = vector.load %arg3[%c0_7, %c0_8] : memref<1x128xf32, #tpu.memory_space<vmem>>, vector<1x128xf32>
    %21 = vector.broadcast %20 : vector<1x128xf32> to vector<16x128xf32>
    %22 = arith.addf %19, %21 : vector<16x128xf32>
    %23 = arith.truncf %22 : vector<16x128xf32> to vector<16x128xbf16>
    %c0_9 = arith.constant 0 : index
    %c0_10 = arith.constant 0 : index
    %24 = vector.load %arg4[%c0_9, %c0_10] : memref<16x128xbf16, #tpu.memory_space<vmem>>, vector<16x128xbf16>
    tpu.vector_store %arg4[%c0_9, %c0_10], %23 {strides = array<i32>} : memref<16x128xbf16, #tpu.memory_space<vmem>>, vector<16x128xbf16>,
    return
  }
  func.func @transform_0(%arg0: i32) -> (i32, i32) {
    %c0_i32 = arith.constant 0 : i32
    %c0_i32_0 = arith.constant 0 : i32
    return %arg0, %c0_i32 : i32, i32
  }
  func.func @transform_1(%arg0: i32) -> (i32, i32) {
    %c0_i32 = arith.constant 0 : i32
    %c0_i32_0 = arith.constant 0 : i32
    %c0_i32_1 = arith.constant 0 : i32
    return %c0_i32, %c0_i32_0 : i32, i32
  }
  func.func @transform_2(%arg0: i32) -> (i32, i32) {
    %c0_i32 = arith.constant 0 : i32
    %c0_i32_0 = arith.constant 0 : i32
    %c0_i32_1 = arith.constant 0 : i32
    return %c0_i32, %c0_i32_0 : i32, i32
  }
  func.func @transform_3(%arg0: i32) -> (i32, i32) {
    %c0_i32 = arith.constant 0 : i32
    %c0_i32_0 = arith.constant 0 : i32
    return %arg0, %c0_i32 : i32, i32
  }
}

module attributes {stable_mosaic.version = 11 : i64} {
  func.func @_mm_kernel(%arg0: i32, %arg1: i32, %arg2: i32, %arg3: memref<16x128xbf16, #tpu.memory_space<vmem>>, %arg4: memref<128x128xbf16, #tpu.memory_space<vmem>>, %arg5: memref<1x128xf32, #tpu.memory_space<vmem>>, %arg6: memref<16x128xbf16, #tpu.memory_space<vmem>>, %arg7: memref<1x128xf32, #tpu.memory_space<vmem>>, %arg8: memref<1x128xf32, #tpu.memory_space<vmem>>, %arg9: memref<16x128xbf16, #tpu.memory_space<vmem>>, %arg10: memref<16x128xf32, #tpu.memory_space<vmem>>) attributes {dimension_semantics = [#tpu.dimension_semantics<parallel>, #tpu.dimension_semantics<parallel>, #tpu.dimension_semantics<arbitrary>], iteration_bounds = array<i64: 1, 1, 1>, scalar_prefetch = 0 : i64, scratch_operands = 1 : i64, tpu.core_type = #tpu.core_type<tc>, window_params = [{transform_indices = @transform_0, window_bounds = array<i64: 16, 128>}, {transform_indices = @transform_1, window_bounds = array<i64: 128, 128>}, {transform_indices = @transform_2, window_bounds = array<i64: 1, 128>}, {transform_indices = @transform_3, window_bounds = array<i64: 16, 128>}, {transform_indices = @transform_4, window_bounds = array<i64: 1, 128>}, {transform_indices = @transform_5, window_bounds = array<i64: 1, 128>}, {transform_indices = @transform_6, window_bounds = array<i64: 16, 128>}]} {
    %c0_i32 = arith.constant 0 : i32
    %0 = arith.cmpi eq, %arg2, %c0_i32 : i32
    %1 = arith.extui %0 : i1 to i32
    %c0_i32_0 = arith.constant 0 : i32
    %2 = arith.cmpi ne, %1, %c0_i32_0 : i32
    scf.if %2 {
      %cst_10 = arith.constant 0.000000e+00 : f32
      %12 = vector.broadcast %cst_10 : f32 to vector<16x128xf32>
      %c0_11 = arith.constant 0 : index
      %c0_12 = arith.constant 0 : index
      %13 = vector.load %arg10[%c0_11, %c0_12] : memref<16x128xf32, #tpu.memory_space<vmem>>, vector<16x128xf32>
      tpu.vector_store %arg10[%c0_11, %c0_12], %12 {strides = array<i32>} : memref<16x128xf32, #tpu.memory_space<vmem>>, vector<16x128xf32>,
    } else {
    }
    %c0 = arith.constant 0 : index
    %c0_1 = arith.constant 0 : index
    %3 = vector.load %arg10[%c0, %c0_1] : memref<16x128xf32, #tpu.memory_space<vmem>>, vector<16x128xf32>
    %c0_2 = arith.constant 0 : index
    %c0_3 = arith.constant 0 : index
    %4 = vector.load %arg3[%c0_2, %c0_3] : memref<16x128xbf16, #tpu.memory_space<vmem>>, vector<16x128xbf16>
    %c0_4 = arith.constant 0 : index
    %c0_5 = arith.constant 0 : index
    %5 = vector.load %arg4[%c0_4, %c0_5] : memref<128x128xbf16, #tpu.memory_space<vmem>>, vector<128x128xbf16>
    %cst = arith.constant dense<0.000000e+00> : vector<16x128xf32>
    %6 = tpu.matmul %4, %5, %cst {dimension_numbers = #tpu.dot_dimension_numbers<[1], [0], [0], [1], [0, 0, 1, 1], [], []>} : vector<16x128xbf16>, vector<128x128xbf16>, vector<16x128xf32> -> vector<16x128xf32>
    %7 = arith.addf %3, %6 : vector<16x128xf32>
    %c0_6 = arith.constant 0 : index
    %c0_7 = arith.constant 0 : index
    %8 = vector.load %arg10[%c0_6, %c0_7] : memref<16x128xf32, #tpu.memory_space<vmem>>, vector<16x128xf32>
    tpu.vector_store %arg10[%c0_6, %c0_7], %7 {strides = array<i32>} : memref<16x128xf32, #tpu.memory_space<vmem>>, vector<16x128xf32>,
    %c0_i32_8 = arith.constant 0 : i32
    %9 = arith.cmpi eq, %arg2, %c0_i32_8 : i32
    %10 = arith.extui %9 : i1 to i32
    %c0_i32_9 = arith.constant 0 : i32
    %11 = arith.cmpi ne, %10, %c0_i32_9 : i32
    scf.if %11 {
      %c0_10 = arith.constant 0 : index
      %c0_11 = arith.constant 0 : index
      %12 = vector.load %arg10[%c0_10, %c0_11] : memref<16x128xf32, #tpu.memory_space<vmem>>, vector<16x128xf32>
      %c0_12 = arith.constant 0 : index
      %c0_13 = arith.constant 0 : index
      %13 = vector.load %arg5[%c0_12, %c0_13] : memref<1x128xf32, #tpu.memory_space<vmem>>, vector<1x128xf32>
      %14 = vector.broadcast %13 : vector<1x128xf32> to vector<16x128xf32>
      %15 = arith.addf %12, %14 : vector<16x128xf32>
      %c0_14 = arith.constant 0 : index
      %c0_15 = arith.constant 0 : index
      %16 = vector.load %arg6[%c0_14, %c0_15] : memref<16x128xbf16, #tpu.memory_space<vmem>>, vector<16x128xbf16>
      %17 = arith.extf %16 : vector<16x128xbf16> to vector<16x128xf32>
      %18 = arith.addf %15, %17 : vector<16x128xf32>
      %cst_16 = arith.constant dense<0.000000e+00> : vector<16xf32>
      %19 = vector.multi_reduction <add>, %18, %cst_16 [1] : vector<16x128xf32> to vector<16xf32>
      %20 = vector.shape_cast %19 : vector<16xf32> to vector<16x1xf32>
      %cst_17 = arith.constant 1.280000e+02 : f32
      %21 = vector.broadcast %cst_17 : f32 to vector<16x1xf32>
      %22 = arith.divf %20, %21 : vector<16x1xf32>
      %23 = vector.broadcast %22 : vector<16x1xf32> to vector<16x128xf32>
      %24 = arith.subf %18, %23 : vector<16x128xf32>
      %25 = arith.mulf %24, %24 : vector<16x128xf32>
      %cst_18 = arith.constant dense<0.000000e+00> : vector<16xf32>
      %26 = vector.multi_reduction <add>, %25, %cst_18 [1] : vector<16x128xf32> to vector<16xf32>
      %27 = vector.shape_cast %26 : vector<16xf32> to vector<16x1xf32>
      %cst_19 = arith.constant 1.280000e+02 : f32
      %28 = vector.broadcast %cst_19 : f32 to vector<16x1xf32>
      %29 = arith.divf %27, %28 : vector<16x1xf32>
      %cst_20 = arith.constant 9.99999996E-13 : f32
      %30 = vector.broadcast %cst_20 : f32 to vector<16x1xf32>
      %31 = arith.addf %29, %30 : vector<16x1xf32>
      %32 = math.rsqrt %31 : vector<16x1xf32>
      %33 = vector.broadcast %32 : vector<16x1xf32> to vector<16x128xf32>
      %34 = arith.mulf %24, %33 : vector<16x128xf32>
      %c0_21 = arith.constant 0 : index
      %c0_22 = arith.constant 0 : index
      %35 = vector.load %arg7[%c0_21, %c0_22] : memref<1x128xf32, #tpu.memory_space<vmem>>, vector<1x128xf32>
      %36 = vector.broadcast %35 : vector<1x128xf32> to vector<16x128xf32>
      %37 = arith.mulf %34, %36 : vector<16x128xf32>
      %c0_23 = arith.constant 0 : index
      %c0_24 = arith.constant 0 : index
      %38 = vector.load %arg8[%c0_23, %c0_24] : memref<1x128xf32, #tpu.memory_space<vmem>>, vector<1x128xf32>
      %39 = vector.broadcast %38 : vector<1x128xf32> to vector<16x128xf32>
      %40 = arith.addf %37, %39 : vector<16x128xf32>
      %41 = arith.truncf %40 : vector<16x128xf32> to vector<16x128xbf16>
      %c0_25 = arith.constant 0 : index
      %c0_26 = arith.constant 0 : index
      %42 = vector.load %arg9[%c0_25, %c0_26] : memref<16x128xbf16, #tpu.memory_space<vmem>>, vector<16x128xbf16>
      tpu.vector_store %arg9[%c0_25, %c0_26], %41 {strides = array<i32>} : memref<16x128xbf16, #tpu.memory_space<vmem>>, vector<16x128xbf16>,
    } else {
    }
    return
  }
  func.func @transform_0(%arg0: i32, %arg1: i32, %arg2: i32) -> (i32, i32) {
    %c0_i32 = arith.constant 0 : i32
    return %arg0, %arg2 : i32, i32
  }
  func.func @transform_1(%arg0: i32, %arg1: i32, %arg2: i32) -> (i32, i32) {
    %c0_i32 = arith.constant 0 : i32
    return %arg2, %arg1 : i32, i32
  }
  func.func @transform_2(%arg0: i32, %arg1: i32, %arg2: i32) -> (i32, i32) {
    %c0_i32 = arith.constant 0 : i32
    %c0_i32_0 = arith.constant 0 : i32
    return %c0_i32, %arg1 : i32, i32
  }
  func.func @transform_3(%arg0: i32, %arg1: i32, %arg2: i32) -> (i32, i32) {
    %c0_i32 = arith.constant 0 : i32
    return %arg0, %arg1 : i32, i32
  }
  func.func @transform_4(%arg0: i32, %arg1: i32, %arg2: i32) -> (i32, i32) {
    %c0_i32 = arith.constant 0 : i32
    %c0_i32_0 = arith.constant 0 : i32
    return %c0_i32, %arg1 : i32, i32
  }
  func.func @transform_5(%arg0: i32, %arg1: i32, %arg2: i32) -> (i32, i32) {
    %c0_i32 = arith.constant 0 : i32
    %c0_i32_0 = arith.constant 0 : i32
    return %c0_i32, %arg1 : i32, i32
  }
  func.func @transform_6(%arg0: i32, %arg1: i32, %arg2: i32) -> (i32, i32) {
    %c0_i32 = arith.constant 0 : i32
    return %arg0, %arg1 : i32, i32
  }
}

module attributes {stable_mosaic.version = 11 : i64} {
  func.func @_mm_kernel(%arg0: i32, %arg1: i32, %arg2: i32, %arg3: memref<16x128xbf16, #tpu.memory_space<vmem>>, %arg4: memref<128x384xbf16, #tpu.memory_space<vmem>>, %arg5: memref<1x384xf32, #tpu.memory_space<vmem>>, %arg6: memref<16x384xbf16, #tpu.memory_space<vmem>>, %arg7: memref<16x384xf32, #tpu.memory_space<vmem>>) attributes {dimension_semantics = [#tpu.dimension_semantics<parallel>, #tpu.dimension_semantics<parallel>, #tpu.dimension_semantics<arbitrary>], iteration_bounds = array<i64: 1, 1, 1>, scalar_prefetch = 0 : i64, scratch_operands = 1 : i64, tpu.core_type = #tpu.core_type<tc>, window_params = [{transform_indices = @transform_0, window_bounds = array<i64: 16, 128>}, {transform_indices = @transform_1, window_bounds = array<i64: 128, 384>}, {transform_indices = @transform_2, window_bounds = array<i64: 1, 384>}, {transform_indices = @transform_3, window_bounds = array<i64: 16, 384>}]} {
    %c0_i32 = arith.constant 0 : i32
    %0 = arith.cmpi eq, %arg2, %c0_i32 : i32
    %1 = arith.extui %0 : i1 to i32
    %c0_i32_0 = arith.constant 0 : i32
    %2 = arith.cmpi ne, %1, %c0_i32_0 : i32
    scf.if %2 {
      %cst_10 = arith.constant 0.000000e+00 : f32
      %12 = vector.broadcast %cst_10 : f32 to vector<16x384xf32>
      %c0_11 = arith.constant 0 : index
      %c0_12 = arith.constant 0 : index
      %13 = vector.load %arg7[%c0_11, %c0_12] : memref<16x384xf32, #tpu.memory_space<vmem>>, vector<16x384xf32>
      tpu.vector_store %arg7[%c0_11, %c0_12], %12 {strides = array<i32>} : memref<16x384xf32, #tpu.memory_space<vmem>>, vector<16x384xf32>,
    } else {
    }
    %c0 = arith.constant 0 : index
    %c0_1 = arith.constant 0 : index
    %3 = vector.load %arg7[%c0, %c0_1] : memref<16x384xf32, #tpu.memory_space<vmem>>, vector<16x384xf32>
    %c0_2 = arith.constant 0 : index
    %c0_3 = arith.constant 0 : index
    %4 = vector.load %arg3[%c0_2, %c0_3] : memref<16x128xbf16, #tpu.memory_space<vmem>>, vector<16x128xbf16>
    %c0_4 = arith.constant 0 : index
    %c0_5 = arith.constant 0 : index
    %5 = vector.load %arg4[%c0_4, %c0_5] : memref<128x384xbf16, #tpu.memory_space<vmem>>, vector<128x384xbf16>
    %cst = arith.constant dense<0.000000e+00> : vector<16x384xf32>
    %6 = tpu.matmul %4, %5, %cst {dimension_numbers = #tpu.dot_dimension_numbers<[1], [0], [0], [1], [0, 0, 1, 1], [], []>} : vector<16x128xbf16>, vector<128x384xbf16>, vector<16x384xf32> -> vector<16x384xf32>
    %7 = arith.addf %3, %6 : vector<16x384xf32>
    %c0_6 = arith.constant 0 : index
    %c0_7 = arith.constant 0 : index
    %8 = vector.load %arg7[%c0_6, %c0_7] : memref<16x384xf32, #tpu.memory_space<vmem>>, vector<16x384xf32>
    tpu.vector_store %arg7[%c0_6, %c0_7], %7 {strides = array<i32>} : memref<16x384xf32, #tpu.memory_space<vmem>>, vector<16x384xf32>,
    %c0_i32_8 = arith.constant 0 : i32
    %9 = arith.cmpi eq, %arg2, %c0_i32_8 : i32
    %10 = arith.extui %9 : i1 to i32
    %c0_i32_9 = arith.constant 0 : i32
    %11 = arith.cmpi ne, %10, %c0_i32_9 : i32
    scf.if %11 {
      %c0_10 = arith.constant 0 : index
      %c0_11 = arith.constant 0 : index
      %12 = vector.load %arg7[%c0_10, %c0_11] : memref<16x384xf32, #tpu.memory_space<vmem>>, vector<16x384xf32>
      %c0_12 = arith.constant 0 : index
      %c0_13 = arith.constant 0 : index
      %13 = vector.load %arg5[%c0_12, %c0_13] : memref<1x384xf32, #tpu.memory_space<vmem>>, vector<1x384xf32>
      %14 = vector.broadcast %13 : vector<1x384xf32> to vector<16x384xf32>
      %15 = arith.addf %12, %14 : vector<16x384xf32>
      %16 = arith.truncf %15 : vector<16x384xf32> to vector<16x384xbf16>
      %c0_14 = arith.constant 0 : index
      %c0_15 = arith.constant 0 : index
      %17 = vector.load %arg6[%c0_14, %c0_15] : memref<16x384xbf16, #tpu.memory_space<vmem>>, vector<16x384xbf16>
      tpu.vector_store %arg6[%c0_14, %c0_15], %16 {strides = array<i32>} : memref<16x384xbf16, #tpu.memory_space<vmem>>, vector<16x384xbf16>,
    } else {
    }
    return
  }
  func.func @transform_0(%arg0: i32, %arg1: i32, %arg2: i32) -> (i32, i32) {
    %c0_i32 = arith.constant 0 : i32
    return %arg0, %arg2 : i32, i32
  }
  func.func @transform_1(%arg0: i32, %arg1: i32, %arg2: i32) -> (i32, i32) {
    %c0_i32 = arith.constant 0 : i32
    return %arg2, %arg1 : i32, i32
  }
  func.func @transform_2(%arg0: i32, %arg1: i32, %arg2: i32) -> (i32, i32) {
    %c0_i32 = arith.constant 0 : i32
    %c0_i32_0 = arith.constant 0 : i32
    return %c0_i32, %arg1 : i32, i32
  }
  func.func @transform_3(%arg0: i32, %arg1: i32, %arg2: i32) -> (i32, i32) {
    %c0_i32 = arith.constant 0 : i32
    return %arg0, %arg1 : i32, i32
  }
}

module attributes {stable_mosaic.version = 11 : i64} {
  func.func @_attn_pair_kernel(%arg0: i32, %arg1: i32, %arg2: memref<1x8x384xbf16, #tpu.memory_space<vmem>>, %arg3: memref<1x1x8xf32, #tpu.memory_space<vmem>>, %arg4: memref<1x8x128xbf16, #tpu.memory_space<vmem>>) attributes {dimension_semantics = [#tpu.dimension_semantics<parallel>, #tpu.dimension_semantics<parallel>], iteration_bounds = array<i64: 2, 1>, scalar_prefetch = 0 : i64, scratch_operands = 0 : i64, tpu.core_type = #tpu.core_type<tc>, window_params = [{transform_indices = @transform_0, window_bounds = array<i64: 1, 8, 384>}, {transform_indices = @transform_1, window_bounds = array<i64: 1, 1, 8>}, {transform_indices = @transform_2, window_bounds = array<i64: 1, 8, 128>}]} {
    %c0 = arith.constant 0 : index
    %c0_0 = arith.constant 0 : index
    %c0_1 = arith.constant 0 : index
    %0 = vector.load %arg3[%c0, %c0_0, %c0_1] : memref<1x1x8xf32, #tpu.memory_space<vmem>>, vector<1x1x8xf32>
    %1 = vector.shape_cast %0 : vector<1x1x8xf32> to vector<1x8xf32>
    %c0_2 = arith.constant 0 : index
    %c0_3 = arith.constant 0 : index
    %c0_4 = arith.constant 0 : index
    %2 = vector.load %arg2[%c0_2, %c0_3, %c0_4] : memref<1x8x384xbf16, #tpu.memory_space<vmem>>, vector<1x8x64xbf16>
    %3 = vector.shape_cast %2 : vector<1x8x64xbf16> to vector<8x64xbf16>
    %c0_5 = arith.constant 0 : index
    %c0_6 = arith.constant 0 : index
    %c128 = arith.constant 128 : index
    %4 = vector.load %arg2[%c0_5, %c0_6, %c128] : memref<1x8x384xbf16, #tpu.memory_space<vmem>>, vector<1x8x64xbf16>
    %5 = vector.shape_cast %4 : vector<1x8x64xbf16> to vector<8x64xbf16>
    %c0_7 = arith.constant 0 : index
    %c0_8 = arith.constant 0 : index
    %c256 = arith.constant 256 : index
    %6 = vector.load %arg2[%c0_7, %c0_8, %c256] : memref<1x8x384xbf16, #tpu.memory_space<vmem>>, vector<1x8x64xbf16>
    %7 = vector.shape_cast %6 : vector<1x8x64xbf16> to vector<8x64xbf16>
    %cst = arith.constant dense<0.000000e+00> : vector<8x8xf32>
    %8 = tpu.matmul %3, %5, %cst {dimension_numbers = #tpu.dot_dimension_numbers<[1], [1], [0], [0], [0, 0, 1, 0], [], []>} : vector<8x64xbf16>, vector<8x64xbf16>, vector<8x8xf32> -> vector<8x8xf32>
    %cst_9 = arith.constant 1.250000e-01 : f32
    %9 = vector.broadcast %cst_9 : f32 to vector<8x8xf32>
    %10 = arith.mulf %8, %9 : vector<8x8xf32>
    %11 = vector.broadcast %1 : vector<1x8xf32> to vector<8x8xf32>
    %12 = arith.addf %10, %11 : vector<8x8xf32>
    %cst_10 = arith.constant dense<0xFF800000> : vector<8xf32>
    %13 = vector.multi_reduction <maximumf>, %12, %cst_10 [1] : vector<8x8xf32> to vector<8xf32>
    %14 = vector.shape_cast %13 : vector<8xf32> to vector<8x1xf32>
    %15 = vector.broadcast %14 : vector<8x1xf32> to vector<8x8xf32>
    %16 = arith.subf %12, %15 : vector<8x8xf32>
    %17 = arith.truncf %16 : vector<8x8xf32> to vector<8x8xbf16>
    %18 = math.exp %17 : vector<8x8xbf16>
    %19 = arith.extf %18 : vector<8x8xbf16> to vector<8x8xf32>
    %cst_11 = arith.constant dense<0.000000e+00> : vector<8xf32>
    %20 = vector.multi_reduction <add>, %19, %cst_11 [1] : vector<8x8xf32> to vector<8xf32>
    %21 = vector.shape_cast %20 : vector<8xf32> to vector<8x1xf32>
    %22 = tpu.reciprocal %21 {approx = true} : vector<8x1xf32> -> vector<8x1xf32>
    %cst_12 = arith.constant dense<0.000000e+00> : vector<8x64xf32>
    %23 = tpu.matmul %18, %7, %cst_12 {dimension_numbers = #tpu.dot_dimension_numbers<[1], [0], [0], [1], [0, 0, 1, 1], [], []>} : vector<8x8xbf16>, vector<8x64xbf16>, vector<8x64xf32> -> vector<8x64xf32>
    %24 = vector.broadcast %22 : vector<8x1xf32> to vector<8x64xf32>
    %25 = arith.mulf %23, %24 : vector<8x64xf32>
    %26 = arith.truncf %25 : vector<8x64xf32> to vector<8x64xbf16>
    %c0_13 = arith.constant 0 : index
    %c0_14 = arith.constant 0 : index
    %c64 = arith.constant 64 : index
    %27 = vector.load %arg2[%c0_13, %c0_14, %c64] : memref<1x8x384xbf16, #tpu.memory_space<vmem>>, vector<1x8x64xbf16>
    %28 = vector.shape_cast %27 : vector<1x8x64xbf16> to vector<8x64xbf16>
    %c0_15 = arith.constant 0 : index
    %c0_16 = arith.constant 0 : index
    %c192 = arith.constant 192 : index
    %29 = vector.load %arg2[%c0_15, %c0_16, %c192] : memref<1x8x384xbf16, #tpu.memory_space<vmem>>, vector<1x8x64xbf16>
    %30 = vector.shape_cast %29 : vector<1x8x64xbf16> to vector<8x64xbf16>
    %c0_17 = arith.constant 0 : index
    %c0_18 = arith.constant 0 : index
    %c320 = arith.constant 320 : index
    %31 = vector.load %arg2[%c0_17, %c0_18, %c320] : memref<1x8x384xbf16, #tpu.memory_space<vmem>>, vector<1x8x64xbf16>
    %32 = vector.shape_cast %31 : vector<1x8x64xbf16> to vector<8x64xbf16>
    %cst_19 = arith.constant dense<0.000000e+00> : vector<8x8xf32>
    %33 = tpu.matmul %28, %30, %cst_19 {dimension_numbers = #tpu.dot_dimension_numbers<[1], [1], [0], [0], [0, 0, 1, 0], [], []>} : vector<8x64xbf16>, vector<8x64xbf16>, vector<8x8xf32> -> vector<8x8xf32>
    %cst_20 = arith.constant 1.250000e-01 : f32
    %34 = vector.broadcast %cst_20 : f32 to vector<8x8xf32>
    %35 = arith.mulf %33, %34 : vector<8x8xf32>
    %36 = vector.broadcast %1 : vector<1x8xf32> to vector<8x8xf32>
    %37 = arith.addf %35, %36 : vector<8x8xf32>
    %cst_21 = arith.constant dense<0xFF800000> : vector<8xf32>
    %38 = vector.multi_reduction <maximumf>, %37, %cst_21 [1] : vector<8x8xf32> to vector<8xf32>
    %39 = vector.shape_cast %38 : vector<8xf32> to vector<8x1xf32>
    %40 = vector.broadcast %39 : vector<8x1xf32> to vector<8x8xf32>
    %41 = arith.subf %37, %40 : vector<8x8xf32>
    %42 = arith.truncf %41 : vector<8x8xf32> to vector<8x8xbf16>
    %43 = math.exp %42 : vector<8x8xbf16>
    %44 = arith.extf %43 : vector<8x8xbf16> to vector<8x8xf32>
    %cst_22 = arith.constant dense<0.000000e+00> : vector<8xf32>
    %45 = vector.multi_reduction <add>, %44, %cst_22 [1] : vector<8x8xf32> to vector<8xf32>
    %46 = vector.shape_cast %45 : vector<8xf32> to vector<8x1xf32>
    %47 = tpu.reciprocal %46 {approx = true} : vector<8x1xf32> -> vector<8x1xf32>
    %cst_23 = arith.constant dense<0.000000e+00> : vector<8x64xf32>
    %48 = tpu.matmul %43, %32, %cst_23 {dimension_numbers = #tpu.dot_dimension_numbers<[1], [0], [0], [1], [0, 0, 1, 1], [], []>} : vector<8x8xbf16>, vector<8x64xbf16>, vector<8x64xf32> -> vector<8x64xf32>
    %49 = vector.broadcast %47 : vector<8x1xf32> to vector<8x64xf32>
    %50 = arith.mulf %48, %49 : vector<8x64xf32>
    %51 = arith.truncf %50 : vector<8x64xf32> to vector<8x64xbf16>
    %52 = tpu.concatenate %26, %51 in 1 : vector<8x64xbf16>, vector<8x64xbf16> -> vector<8x128xbf16>
    %c0_24 = arith.constant 0 : index
    %c0_25 = arith.constant 0 : index
    %c0_26 = arith.constant 0 : index
    %53 = vector.load %arg4[%c0_24, %c0_25, %c0_26] : memref<1x8x128xbf16, #tpu.memory_space<vmem>>, vector<1x8x128xbf16>
    %54 = vector.shape_cast %53 : vector<1x8x128xbf16> to vector<8x128xbf16>
    %55 = vector.shape_cast %52 : vector<8x128xbf16> to vector<1x8x128xbf16>
    tpu.vector_store %arg4[%c0_24, %c0_25, %c0_26], %55 {strides = array<i32>} : memref<1x8x128xbf16, #tpu.memory_space<vmem>>, vector<1x8x128xbf16>,
    return
  }
  func.func @transform_0(%arg0: i32, %arg1: i32) -> (i32, i32, i32) {
    %c0_i32 = arith.constant 0 : i32
    %c0_i32_0 = arith.constant 0 : i32
    return %arg0, %c0_i32, %arg1 : i32, i32, i32
  }
  func.func @transform_1(%arg0: i32, %arg1: i32) -> (i32, i32, i32) {
    %c0_i32 = arith.constant 0 : i32
    %c0_i32_0 = arith.constant 0 : i32
    %c0_i32_1 = arith.constant 0 : i32
    return %arg0, %c0_i32, %c0_i32_0 : i32, i32, i32
  }
  func.func @transform_2(%arg0: i32, %arg1: i32) -> (i32, i32, i32) {
    %c0_i32 = arith.constant 0 : i32
    %c0_i32_0 = arith.constant 0 : i32
    return %arg0, %c0_i32, %arg1 : i32, i32, i32
  }
}

module attributes {stable_mosaic.version = 11 : i64} {
  func.func @_mm_kernel(%arg0: i32, %arg1: i32, %arg2: i32, %arg3: memref<16x128xbf16, #tpu.memory_space<vmem>>, %arg4: memref<128x256xbf16, #tpu.memory_space<vmem>>, %arg5: memref<1x256xf32, #tpu.memory_space<vmem>>, %arg6: memref<16x256xbf16, #tpu.memory_space<vmem>>, %arg7: memref<16x256xf32, #tpu.memory_space<vmem>>) attributes {dimension_semantics = [#tpu.dimension_semantics<parallel>, #tpu.dimension_semantics<parallel>, #tpu.dimension_semantics<arbitrary>], iteration_bounds = array<i64: 1, 1, 1>, scalar_prefetch = 0 : i64, scratch_operands = 1 : i64, tpu.core_type = #tpu.core_type<tc>, window_params = [{transform_indices = @transform_0, window_bounds = array<i64: 16, 128>}, {transform_indices = @transform_1, window_bounds = array<i64: 128, 256>}, {transform_indices = @transform_2, window_bounds = array<i64: 1, 256>}, {transform_indices = @transform_3, window_bounds = array<i64: 16, 256>}]} {
    %c0_i32 = arith.constant 0 : i32
    %0 = arith.cmpi eq, %arg2, %c0_i32 : i32
    %1 = arith.extui %0 : i1 to i32
    %c0_i32_0 = arith.constant 0 : i32
    %2 = arith.cmpi ne, %1, %c0_i32_0 : i32
    scf.if %2 {
      %cst_10 = arith.constant 0.000000e+00 : f32
      %12 = vector.broadcast %cst_10 : f32 to vector<16x256xf32>
      %c0_11 = arith.constant 0 : index
      %c0_12 = arith.constant 0 : index
      %13 = vector.load %arg7[%c0_11, %c0_12] : memref<16x256xf32, #tpu.memory_space<vmem>>, vector<16x256xf32>
      tpu.vector_store %arg7[%c0_11, %c0_12], %12 {strides = array<i32>} : memref<16x256xf32, #tpu.memory_space<vmem>>, vector<16x256xf32>,
    } else {
    }
    %c0 = arith.constant 0 : index
    %c0_1 = arith.constant 0 : index
    %3 = vector.load %arg7[%c0, %c0_1] : memref<16x256xf32, #tpu.memory_space<vmem>>, vector<16x256xf32>
    %c0_2 = arith.constant 0 : index
    %c0_3 = arith.constant 0 : index
    %4 = vector.load %arg3[%c0_2, %c0_3] : memref<16x128xbf16, #tpu.memory_space<vmem>>, vector<16x128xbf16>
    %c0_4 = arith.constant 0 : index
    %c0_5 = arith.constant 0 : index
    %5 = vector.load %arg4[%c0_4, %c0_5] : memref<128x256xbf16, #tpu.memory_space<vmem>>, vector<128x256xbf16>
    %cst = arith.constant dense<0.000000e+00> : vector<16x256xf32>
    %6 = tpu.matmul %4, %5, %cst {dimension_numbers = #tpu.dot_dimension_numbers<[1], [0], [0], [1], [0, 0, 1, 1], [], []>} : vector<16x128xbf16>, vector<128x256xbf16>, vector<16x256xf32> -> vector<16x256xf32>
    %7 = arith.addf %3, %6 : vector<16x256xf32>
    %c0_6 = arith.constant 0 : index
    %c0_7 = arith.constant 0 : index
    %8 = vector.load %arg7[%c0_6, %c0_7] : memref<16x256xf32, #tpu.memory_space<vmem>>, vector<16x256xf32>
    tpu.vector_store %arg7[%c0_6, %c0_7], %7 {strides = array<i32>} : memref<16x256xf32, #tpu.memory_space<vmem>>, vector<16x256xf32>,
    %c0_i32_8 = arith.constant 0 : i32
    %9 = arith.cmpi eq, %arg2, %c0_i32_8 : i32
    %10 = arith.extui %9 : i1 to i32
    %c0_i32_9 = arith.constant 0 : i32
    %11 = arith.cmpi ne, %10, %c0_i32_9 : i32
    scf.if %11 {
      %c0_10 = arith.constant 0 : index
      %c0_11 = arith.constant 0 : index
      %12 = vector.load %arg7[%c0_10, %c0_11] : memref<16x256xf32, #tpu.memory_space<vmem>>, vector<16x256xf32>
      %c0_12 = arith.constant 0 : index
      %c0_13 = arith.constant 0 : index
      %13 = vector.load %arg5[%c0_12, %c0_13] : memref<1x256xf32, #tpu.memory_space<vmem>>, vector<1x256xf32>
      %14 = vector.broadcast %13 : vector<1x256xf32> to vector<16x256xf32>
      %15 = arith.addf %12, %14 : vector<16x256xf32>
      %cst_14 = arith.constant 5.000000e-01 : f32
      %16 = vector.broadcast %cst_14 : f32 to vector<16x256xf32>
      %17 = arith.mulf %16, %15 : vector<16x256xf32>
      %cst_15 = arith.constant 4.471500e-02 : f32
      %18 = vector.broadcast %cst_15 : f32 to vector<16x256xf32>
      %19 = arith.mulf %18, %15 : vector<16x256xf32>
      %20 = arith.mulf %19, %15 : vector<16x256xf32>
      %21 = arith.mulf %20, %15 : vector<16x256xf32>
      %22 = arith.addf %15, %21 : vector<16x256xf32>
      %cst_16 = arith.constant 0.797884583 : f32
      %23 = vector.broadcast %cst_16 : f32 to vector<16x256xf32>
      %24 = arith.mulf %23, %22 : vector<16x256xf32>
      %25 = math.tanh %24 : vector<16x256xf32>
      %cst_17 = arith.constant 1.000000e+00 : f32
      %26 = vector.broadcast %cst_17 : f32 to vector<16x256xf32>
      %27 = arith.addf %26, %25 : vector<16x256xf32>
      %28 = arith.mulf %17, %27 : vector<16x256xf32>
      %29 = arith.truncf %28 : vector<16x256xf32> to vector<16x256xbf16>
      %c0_18 = arith.constant 0 : index
      %c0_19 = arith.constant 0 : index
      %30 = vector.load %arg6[%c0_18, %c0_19] : memref<16x256xbf16, #tpu.memory_space<vmem>>, vector<16x256xbf16>
      tpu.vector_store %arg6[%c0_18, %c0_19], %29 {strides = array<i32>} : memref<16x256xbf16, #tpu.memory_space<vmem>>, vector<16x256xbf16>,
    } else {
    }
    return
  }
  func.func @transform_0(%arg0: i32, %arg1: i32, %arg2: i32) -> (i32, i32) {
    %c0_i32 = arith.constant 0 : i32
    return %arg0, %arg2 : i32, i32
  }
  func.func @transform_1(%arg0: i32, %arg1: i32, %arg2: i32) -> (i32, i32) {
    %c0_i32 = arith.constant 0 : i32
    return %arg2, %arg1 : i32, i32
  }
  func.func @transform_2(%arg0: i32, %arg1: i32, %arg2: i32) -> (i32, i32) {
    %c0_i32 = arith.constant 0 : i32
    %c0_i32_0 = arith.constant 0 : i32
    return %c0_i32, %arg1 : i32, i32
  }
  func.func @transform_3(%arg0: i32, %arg1: i32, %arg2: i32) -> (i32, i32) {
    %c0_i32 = arith.constant 0 : i32
    return %arg0, %arg1 : i32, i32
  }
}

module attributes {stable_mosaic.version = 11 : i64} {
  func.func @_mm_kernel(%arg0: i32, %arg1: i32, %arg2: i32, %arg3: memref<16x256xbf16, #tpu.memory_space<vmem>>, %arg4: memref<256x128xbf16, #tpu.memory_space<vmem>>, %arg5: memref<1x128xf32, #tpu.memory_space<vmem>>, %arg6: memref<16x128xbf16, #tpu.memory_space<vmem>>, %arg7: memref<1x128xf32, #tpu.memory_space<vmem>>, %arg8: memref<1x128xf32, #tpu.memory_space<vmem>>, %arg9: memref<16x128xbf16, #tpu.memory_space<vmem>>, %arg10: memref<16x128xf32, #tpu.memory_space<vmem>>) attributes {dimension_semantics = [#tpu.dimension_semantics<parallel>, #tpu.dimension_semantics<parallel>, #tpu.dimension_semantics<arbitrary>], iteration_bounds = array<i64: 1, 1, 1>, scalar_prefetch = 0 : i64, scratch_operands = 1 : i64, tpu.core_type = #tpu.core_type<tc>, window_params = [{transform_indices = @transform_0, window_bounds = array<i64: 16, 256>}, {transform_indices = @transform_1, window_bounds = array<i64: 256, 128>}, {transform_indices = @transform_2, window_bounds = array<i64: 1, 128>}, {transform_indices = @transform_3, window_bounds = array<i64: 16, 128>}, {transform_indices = @transform_4, window_bounds = array<i64: 1, 128>}, {transform_indices = @transform_5, window_bounds = array<i64: 1, 128>}, {transform_indices = @transform_6, window_bounds = array<i64: 16, 128>}]} {
    %c0_i32 = arith.constant 0 : i32
    %0 = arith.cmpi eq, %arg2, %c0_i32 : i32
    %1 = arith.extui %0 : i1 to i32
    %c0_i32_0 = arith.constant 0 : i32
    %2 = arith.cmpi ne, %1, %c0_i32_0 : i32
    scf.if %2 {
      %cst_10 = arith.constant 0.000000e+00 : f32
      %12 = vector.broadcast %cst_10 : f32 to vector<16x128xf32>
      %c0_11 = arith.constant 0 : index
      %c0_12 = arith.constant 0 : index
      %13 = vector.load %arg10[%c0_11, %c0_12] : memref<16x128xf32, #tpu.memory_space<vmem>>, vector<16x128xf32>
      tpu.vector_store %arg10[%c0_11, %c0_12], %12 {strides = array<i32>} : memref<16x128xf32, #tpu.memory_space<vmem>>, vector<16x128xf32>,
    } else {
    }
    %c0 = arith.constant 0 : index
    %c0_1 = arith.constant 0 : index
    %3 = vector.load %arg10[%c0, %c0_1] : memref<16x128xf32, #tpu.memory_space<vmem>>, vector<16x128xf32>
    %c0_2 = arith.constant 0 : index
    %c0_3 = arith.constant 0 : index
    %4 = vector.load %arg3[%c0_2, %c0_3] : memref<16x256xbf16, #tpu.memory_space<vmem>>, vector<16x256xbf16>
    %c0_4 = arith.constant 0 : index
    %c0_5 = arith.constant 0 : index
    %5 = vector.load %arg4[%c0_4, %c0_5] : memref<256x128xbf16, #tpu.memory_space<vmem>>, vector<256x128xbf16>
    %cst = arith.constant dense<0.000000e+00> : vector<16x128xf32>
    %6 = tpu.matmul %4, %5, %cst {dimension_numbers = #tpu.dot_dimension_numbers<[1], [0], [0], [1], [0, 0, 1, 1], [], []>} : vector<16x256xbf16>, vector<256x128xbf16>, vector<16x128xf32> -> vector<16x128xf32>
    %7 = arith.addf %3, %6 : vector<16x128xf32>
    %c0_6 = arith.constant 0 : index
    %c0_7 = arith.constant 0 : index
    %8 = vector.load %arg10[%c0_6, %c0_7] : memref<16x128xf32, #tpu.memory_space<vmem>>, vector<16x128xf32>
    tpu.vector_store %arg10[%c0_6, %c0_7], %7 {strides = array<i32>} : memref<16x128xf32, #tpu.memory_space<vmem>>, vector<16x128xf32>,
    %c0_i32_8 = arith.constant 0 : i32
    %9 = arith.cmpi eq, %arg2, %c0_i32_8 : i32
    %10 = arith.extui %9 : i1 to i32
    %c0_i32_9 = arith.constant 0 : i32
    %11 = arith.cmpi ne, %10, %c0_i32_9 : i32
    scf.if %11 {
      %c0_10 = arith.constant 0 : index
      %c0_11 = arith.constant 0 : index
      %12 = vector.load %arg10[%c0_10, %c0_11] : memref<16x128xf32, #tpu.memory_space<vmem>>, vector<16x128xf32>
      %c0_12 = arith.constant 0 : index
      %c0_13 = arith.constant 0 : index
      %13 = vector.load %arg5[%c0_12, %c0_13] : memref<1x128xf32, #tpu.memory_space<vmem>>, vector<1x128xf32>
      %14 = vector.broadcast %13 : vector<1x128xf32> to vector<16x128xf32>
      %15 = arith.addf %12, %14 : vector<16x128xf32>
      %c0_14 = arith.constant 0 : index
      %c0_15 = arith.constant 0 : index
      %16 = vector.load %arg6[%c0_14, %c0_15] : memref<16x128xbf16, #tpu.memory_space<vmem>>, vector<16x128xbf16>
      %17 = arith.extf %16 : vector<16x128xbf16> to vector<16x128xf32>
      %18 = arith.addf %15, %17 : vector<16x128xf32>
      %cst_16 = arith.constant dense<0.000000e+00> : vector<16xf32>
      %19 = vector.multi_reduction <add>, %18, %cst_16 [1] : vector<16x128xf32> to vector<16xf32>
      %20 = vector.shape_cast %19 : vector<16xf32> to vector<16x1xf32>
      %cst_17 = arith.constant 1.280000e+02 : f32
      %21 = vector.broadcast %cst_17 : f32 to vector<16x1xf32>
      %22 = arith.divf %20, %21 : vector<16x1xf32>
      %23 = vector.broadcast %22 : vector<16x1xf32> to vector<16x128xf32>
      %24 = arith.subf %18, %23 : vector<16x128xf32>
      %25 = arith.mulf %24, %24 : vector<16x128xf32>
      %cst_18 = arith.constant dense<0.000000e+00> : vector<16xf32>
      %26 = vector.multi_reduction <add>, %25, %cst_18 [1] : vector<16x128xf32> to vector<16xf32>
      %27 = vector.shape_cast %26 : vector<16xf32> to vector<16x1xf32>
      %cst_19 = arith.constant 1.280000e+02 : f32
      %28 = vector.broadcast %cst_19 : f32 to vector<16x1xf32>
      %29 = arith.divf %27, %28 : vector<16x1xf32>
      %cst_20 = arith.constant 9.99999996E-13 : f32
      %30 = vector.broadcast %cst_20 : f32 to vector<16x1xf32>
      %31 = arith.addf %29, %30 : vector<16x1xf32>
      %32 = math.rsqrt %31 : vector<16x1xf32>
      %33 = vector.broadcast %32 : vector<16x1xf32> to vector<16x128xf32>
      %34 = arith.mulf %24, %33 : vector<16x128xf32>
      %c0_21 = arith.constant 0 : index
      %c0_22 = arith.constant 0 : index
      %35 = vector.load %arg7[%c0_21, %c0_22] : memref<1x128xf32, #tpu.memory_space<vmem>>, vector<1x128xf32>
      %36 = vector.broadcast %35 : vector<1x128xf32> to vector<16x128xf32>
      %37 = arith.mulf %34, %36 : vector<16x128xf32>
      %c0_23 = arith.constant 0 : index
      %c0_24 = arith.constant 0 : index
      %38 = vector.load %arg8[%c0_23, %c0_24] : memref<1x128xf32, #tpu.memory_space<vmem>>, vector<1x128xf32>
      %39 = vector.broadcast %38 : vector<1x128xf32> to vector<16x128xf32>
      %40 = arith.addf %37, %39 : vector<16x128xf32>
      %41 = arith.truncf %40 : vector<16x128xf32> to vector<16x128xbf16>
      %c0_25 = arith.constant 0 : index
      %c0_26 = arith.constant 0 : index
      %42 = vector.load %arg9[%c0_25, %c0_26] : memref<16x128xbf16, #tpu.memory_space<vmem>>, vector<16x128xbf16>
      tpu.vector_store %arg9[%c0_25, %c0_26], %41 {strides = array<i32>} : memref<16x128xbf16, #tpu.memory_space<vmem>>, vector<16x128xbf16>,
    } else {
    }
    return
  }
  func.func @transform_0(%arg0: i32, %arg1: i32, %arg2: i32) -> (i32, i32) {
    %c0_i32 = arith.constant 0 : i32
    return %arg0, %arg2 : i32, i32
  }
  func.func @transform_1(%arg0: i32, %arg1: i32, %arg2: i32) -> (i32, i32) {
    %c0_i32 = arith.constant 0 : i32
    return %arg2, %arg1 : i32, i32
  }
  func.func @transform_2(%arg0: i32, %arg1: i32, %arg2: i32) -> (i32, i32) {
    %c0_i32 = arith.constant 0 : i32
    %c0_i32_0 = arith.constant 0 : i32
    return %c0_i32, %arg1 : i32, i32
  }
  func.func @transform_3(%arg0: i32, %arg1: i32, %arg2: i32) -> (i32, i32) {
    %c0_i32 = arith.constant 0 : i32
    return %arg0, %arg1 : i32, i32
  }
  func.func @transform_4(%arg0: i32, %arg1: i32, %arg2: i32) -> (i32, i32) {
    %c0_i32 = arith.constant 0 : i32
    %c0_i32_0 = arith.constant 0 : i32
    return %c0_i32, %arg1 : i32, i32
  }
  func.func @transform_5(%arg0: i32, %arg1: i32, %arg2: i32) -> (i32, i32) {
    %c0_i32 = arith.constant 0 : i32
    %c0_i32_0 = arith.constant 0 : i32
    return %c0_i32, %arg1 : i32, i32
  }
  func.func @transform_6(%arg0: i32, %arg1: i32, %arg2: i32) -> (i32, i32) {
    %c0_i32 = arith.constant 0 : i32
    return %arg0, %arg1 : i32, i32
  }
}

module attributes {stable_mosaic.version = 11 : i64} {
  func.func @_mm_kernel(%arg0: i32, %arg1: i32, %arg2: i32, %arg3: memref<2x128xbf16, #tpu.memory_space<vmem>>, %arg4: memref<128x128xbf16, #tpu.memory_space<vmem>>, %arg5: memref<1x128xf32, #tpu.memory_space<vmem>>, %arg6: memref<2x128xbf16, #tpu.memory_space<vmem>>, %arg7: memref<2x128xf32, #tpu.memory_space<vmem>>) attributes {dimension_semantics = [#tpu.dimension_semantics<parallel>, #tpu.dimension_semantics<parallel>, #tpu.dimension_semantics<arbitrary>], iteration_bounds = array<i64: 1, 1, 1>, scalar_prefetch = 0 : i64, scratch_operands = 1 : i64, tpu.core_type = #tpu.core_type<tc>, window_params = [{transform_indices = @transform_0, window_bounds = array<i64: 2, 128>}, {transform_indices = @transform_1, window_bounds = array<i64: 128, 128>}, {transform_indices = @transform_2, window_bounds = array<i64: 1, 128>}, {transform_indices = @transform_3, window_bounds = array<i64: 2, 128>}]} {
    %c0_i32 = arith.constant 0 : i32
    %0 = arith.cmpi eq, %arg2, %c0_i32 : i32
    %1 = arith.extui %0 : i1 to i32
    %c0_i32_0 = arith.constant 0 : i32
    %2 = arith.cmpi ne, %1, %c0_i32_0 : i32
    scf.if %2 {
      %cst_10 = arith.constant 0.000000e+00 : f32
      %12 = vector.broadcast %cst_10 : f32 to vector<2x128xf32>
      %c0_11 = arith.constant 0 : index
      %c0_12 = arith.constant 0 : index
      %13 = vector.load %arg7[%c0_11, %c0_12] : memref<2x128xf32, #tpu.memory_space<vmem>>, vector<2x128xf32>
      tpu.vector_store %arg7[%c0_11, %c0_12], %12 {strides = array<i32>} : memref<2x128xf32, #tpu.memory_space<vmem>>, vector<2x128xf32>,
    } else {
    }
    %c0 = arith.constant 0 : index
    %c0_1 = arith.constant 0 : index
    %3 = vector.load %arg7[%c0, %c0_1] : memref<2x128xf32, #tpu.memory_space<vmem>>, vector<2x128xf32>
    %c0_2 = arith.constant 0 : index
    %c0_3 = arith.constant 0 : index
    %4 = vector.load %arg3[%c0_2, %c0_3] : memref<2x128xbf16, #tpu.memory_space<vmem>>, vector<2x128xbf16>
    %c0_4 = arith.constant 0 : index
    %c0_5 = arith.constant 0 : index
    %5 = vector.load %arg4[%c0_4, %c0_5] : memref<128x128xbf16, #tpu.memory_space<vmem>>, vector<128x128xbf16>
    %cst = arith.constant dense<0.000000e+00> : vector<2x128xf32>
    %6 = tpu.matmul %4, %5, %cst {dimension_numbers = #tpu.dot_dimension_numbers<[1], [0], [0], [1], [0, 0, 1, 1], [], []>} : vector<2x128xbf16>, vector<128x128xbf16>, vector<2x128xf32> -> vector<2x128xf32>
    %7 = arith.addf %3, %6 : vector<2x128xf32>
    %c0_6 = arith.constant 0 : index
    %c0_7 = arith.constant 0 : index
    %8 = vector.load %arg7[%c0_6, %c0_7] : memref<2x128xf32, #tpu.memory_space<vmem>>, vector<2x128xf32>
    tpu.vector_store %arg7[%c0_6, %c0_7], %7 {strides = array<i32>} : memref<2x128xf32, #tpu.memory_space<vmem>>, vector<2x128xf32>,
    %c0_i32_8 = arith.constant 0 : i32
    %9 = arith.cmpi eq, %arg2, %c0_i32_8 : i32
    %10 = arith.extui %9 : i1 to i32
    %c0_i32_9 = arith.constant 0 : i32
    %11 = arith.cmpi ne, %10, %c0_i32_9 : i32
    scf.if %11 {
      %c0_10 = arith.constant 0 : index
      %c0_11 = arith.constant 0 : index
      %12 = vector.load %arg7[%c0_10, %c0_11] : memref<2x128xf32, #tpu.memory_space<vmem>>, vector<2x128xf32>
      %c0_12 = arith.constant 0 : index
      %c0_13 = arith.constant 0 : index
      %13 = vector.load %arg5[%c0_12, %c0_13] : memref<1x128xf32, #tpu.memory_space<vmem>>, vector<1x128xf32>
      %14 = vector.broadcast %13 : vector<1x128xf32> to vector<2x128xf32>
      %15 = arith.addf %12, %14 : vector<2x128xf32>
      %16 = math.tanh %15 : vector<2x128xf32>
      %17 = arith.truncf %16 : vector<2x128xf32> to vector<2x128xbf16>
      %c0_14 = arith.constant 0 : index
      %c0_15 = arith.constant 0 : index
      %18 = vector.load %arg6[%c0_14, %c0_15] : memref<2x128xbf16, #tpu.memory_space<vmem>>, vector<2x128xbf16>
      tpu.vector_store %arg6[%c0_14, %c0_15], %17 {strides = array<i32>} : memref<2x128xbf16, #tpu.memory_space<vmem>>, vector<2x128xbf16>,
    } else {
    }
    return
  }
  func.func @transform_0(%arg0: i32, %arg1: i32, %arg2: i32) -> (i32, i32) {
    %c0_i32 = arith.constant 0 : i32
    return %arg0, %arg2 : i32, i32
  }
  func.func @transform_1(%arg0: i32, %arg1: i32, %arg2: i32) -> (i32, i32) {
    %c0_i32 = arith.constant 0 : i32
    return %arg2, %arg1 : i32, i32
  }
  func.func @transform_2(%arg0: i32, %arg1: i32, %arg2: i32) -> (i32, i32) {
    %c0_i32 = arith.constant 0 : i32
    %c0_i32_0 = arith.constant 0 : i32
    return %c0_i32, %arg1 : i32, i32
  }
  func.func @transform_3(%arg0: i32, %arg1: i32, %arg2: i32) -> (i32, i32) {
    %c0_i32 = arith.constant 0 : i32
    return %arg0, %arg1 : i32, i32
  }
}

module attributes {stable_mosaic.version = 11 : i64} {
  func.func @_mm_kernel(%arg0: i32, %arg1: i32, %arg2: i32, %arg3: memref<2x128xbf16, #tpu.memory_space<vmem>>, %arg4: memref<128x3xbf16, #tpu.memory_space<vmem>>, %arg5: memref<1x3xf32, #tpu.memory_space<vmem>>, %arg6: memref<2x3xf32, #tpu.memory_space<vmem>>, %arg7: memref<2x3xf32, #tpu.memory_space<vmem>>) attributes {dimension_semantics = [#tpu.dimension_semantics<parallel>, #tpu.dimension_semantics<parallel>, #tpu.dimension_semantics<arbitrary>], iteration_bounds = array<i64: 1, 1, 1>, scalar_prefetch = 0 : i64, scratch_operands = 1 : i64, tpu.core_type = #tpu.core_type<tc>, window_params = [{transform_indices = @transform_0, window_bounds = array<i64: 2, 128>}, {transform_indices = @transform_1, window_bounds = array<i64: 128, 3>}, {transform_indices = @transform_2, window_bounds = array<i64: 1, 3>}, {transform_indices = @transform_3, window_bounds = array<i64: 2, 3>}]} {
    %c0_i32 = arith.constant 0 : i32
    %0 = arith.cmpi eq, %arg2, %c0_i32 : i32
    %1 = arith.extui %0 : i1 to i32
    %c0_i32_0 = arith.constant 0 : i32
    %2 = arith.cmpi ne, %1, %c0_i32_0 : i32
    scf.if %2 {
      %cst_10 = arith.constant 0.000000e+00 : f32
      %12 = vector.broadcast %cst_10 : f32 to vector<2x3xf32>
      %c0_11 = arith.constant 0 : index
      %c0_12 = arith.constant 0 : index
      %13 = vector.load %arg7[%c0_11, %c0_12] : memref<2x3xf32, #tpu.memory_space<vmem>>, vector<2x3xf32>
      tpu.vector_store %arg7[%c0_11, %c0_12], %12 {strides = array<i32>} : memref<2x3xf32, #tpu.memory_space<vmem>>, vector<2x3xf32>,
    } else {
    }
    %c0 = arith.constant 0 : index
    %c0_1 = arith.constant 0 : index
    %3 = vector.load %arg7[%c0, %c0_1] : memref<2x3xf32, #tpu.memory_space<vmem>>, vector<2x3xf32>
    %c0_2 = arith.constant 0 : index
    %c0_3 = arith.constant 0 : index
    %4 = vector.load %arg3[%c0_2, %c0_3] : memref<2x128xbf16, #tpu.memory_space<vmem>>, vector<2x128xbf16>
    %c0_4 = arith.constant 0 : index
    %c0_5 = arith.constant 0 : index
    %5 = vector.load %arg4[%c0_4, %c0_5] : memref<128x3xbf16, #tpu.memory_space<vmem>>, vector<128x3xbf16>
    %cst = arith.constant dense<0.000000e+00> : vector<2x3xf32>
    %6 = tpu.matmul %4, %5, %cst {dimension_numbers = #tpu.dot_dimension_numbers<[1], [0], [0], [1], [0, 0, 1, 1], [], []>} : vector<2x128xbf16>, vector<128x3xbf16>, vector<2x3xf32> -> vector<2x3xf32>
    %7 = arith.addf %3, %6 : vector<2x3xf32>
    %c0_6 = arith.constant 0 : index
    %c0_7 = arith.constant 0 : index
    %8 = vector.load %arg7[%c0_6, %c0_7] : memref<2x3xf32, #tpu.memory_space<vmem>>, vector<2x3xf32>
    tpu.vector_store %arg7[%c0_6, %c0_7], %7 {strides = array<i32>} : memref<2x3xf32, #tpu.memory_space<vmem>>, vector<2x3xf32>,
    %c0_i32_8 = arith.constant 0 : i32
    %9 = arith.cmpi eq, %arg2, %c0_i32_8 : i32
    %10 = arith.extui %9 : i1 to i32
    %c0_i32_9 = arith.constant 0 : i32
    %11 = arith.cmpi ne, %10, %c0_i32_9 : i32
    scf.if %11 {
      %c0_10 = arith.constant 0 : index
      %c0_11 = arith.constant 0 : index
      %12 = vector.load %arg7[%c0_10, %c0_11] : memref<2x3xf32, #tpu.memory_space<vmem>>, vector<2x3xf32>
      %c0_12 = arith.constant 0 : index
      %c0_13 = arith.constant 0 : index
      %13 = vector.load %arg5[%c0_12, %c0_13] : memref<1x3xf32, #tpu.memory_space<vmem>>, vector<1x3xf32>
      %14 = vector.broadcast %13 : vector<1x3xf32> to vector<2x3xf32>
      %15 = arith.addf %12, %14 : vector<2x3xf32>
      %c0_14 = arith.constant 0 : index
      %c0_15 = arith.constant 0 : index
      %16 = vector.load %arg6[%c0_14, %c0_15] : memref<2x3xf32, #tpu.memory_space<vmem>>, vector<2x3xf32>
      tpu.vector_store %arg6[%c0_14, %c0_15], %15 {strides = array<i32>} : memref<2x3xf32, #tpu.memory_space<vmem>>, vector<2x3xf32>,
    } else {
    }
    return
  }
  func.func @transform_0(%arg0: i32, %arg1: i32, %arg2: i32) -> (i32, i32) {
    %c0_i32 = arith.constant 0 : i32
    return %arg0, %arg2 : i32, i32
  }
  func.func @transform_1(%arg0: i32, %arg1: i32, %arg2: i32) -> (i32, i32) {
    %c0_i32 = arith.constant 0 : i32
    return %arg2, %arg1 : i32, i32
  }
  func.func @transform_2(%arg0: i32, %arg1: i32, %arg2: i32) -> (i32, i32) {
    %c0_i32 = arith.constant 0 : i32
    %c0_i32_0 = arith.constant 0 : i32
    return %c0_i32, %arg1 : i32, i32
  }
  func.func @transform_3(%arg0: i32, %arg1: i32, %arg2: i32) -> (i32, i32) {
    %c0_i32 = arith.constant 0 : i32
    return %arg0, %arg1 : i32, i32
  }
}

</mosaic_0001>

<bundles_post_ra>
// kernel: bert_forward.13
= control target key start
LH: loop header
LB: loop body
LE: loop exit
PB: predicated region body
PF: predicated region fallthrough
CT: control target
= control target key end

     0   :  { %s121_s0 = inlined_call_operand.vmem [shape: f32[16,128], index: 0, kind: input, shape index: {}]   ;;  %s122_s1 = inlined_call_operand.vmem [shape: f32[1,128], index: 1, kind: input, shape index: {}]   ;;  %s123_s2 = inlined_call_operand.vmem [shape: f32[1,128], index: 2, kind: input, shape index: {}]   ;;  %s124_s3 = inlined_call_operand.vmem [shape: bf16[16,128], index: 3, kind: output, shape index: {}]  }
   0x1   :  { %v14_v0 = vld [vmem:[%s121_s0] sm:$0xff]  ;;  %v15_v1 = vld [vmem:[%s121_s0 + $0x8] sm:$0xff] }
   0x2   :  { %16 = vadd.xlane.f32.xlu0 %v14_v0  ;;  %v71_v18 = vld [vmem:[%s122_s1] ss:$0 sm:$0xff] }
   0x3   :  { %v72_v22 = vld [vmem:[%s123_s2] ss:$0 sm:$0xff] }
   0x6   :  { %18 = vadd.xlane.f32.xlu0 %v15_v1 }
  0x8b   :  { %v17_v2 = vpop.xlane.xlu0 %16 }
  0x8c   :  { %v21_v3 = vmul.f32 0.0078125, %v17_v2 }
  0x8e   :  { %v23_v4 = vsub.f32 %v14_v0, %v21_v3 }
  0x8f   :  { %v19_v5 = vpop.xlane.xlu0 %18 }
  0x90   :  { %v22_v6 = vmul.f32 0.0078125, %v19_v5  ;;  %v25_v7 = vmul.f32 %v23_v4, %v23_v4 }
  0x92   :  { %v24_v8 = vsub.f32 %v15_v1, %v22_v6  ;;  %27 = vadd.xlane.f32.xlu1 %v25_v7 }
  0x94   :  { %v26_v9 = vmul.f32 %v24_v8, %v24_v8 }
  0x96   :  { %29 = vadd.xlane.f32.xlu1 %v26_v9 }
 0x11b   :  { %v28_v10 = vpop.xlane.xlu1 %27 }
 0x11c   :  { %v31_v11 = vmul.f32 0.0078125, %v28_v10 }
 0x11e   :  { %v33_v12 = vadd.f32 1e-12, %v31_v11 }
 0x11f   :  { %v30_v13 = vpop.xlane.xlu1 %29 }
 0x120   :  { %82 = vrsqrt.f32 %v33_v12  ;;  %v32_v14 = vmul.f32 0.0078125, %v30_v13 }
 0x122   :  { %v34_v15 = vadd.f32 1e-12, %v32_v14 }
 0x124   :  { %84 = vrsqrt.f32 %v34_v15 }
 0x12d   :  { %v83_v16 = vpop.eup %82 }
 0x12e   :  { %v37_v17 = vmul.f32 %v83_v16, %v23_v4 }
 0x130   :  { %v46_v20 = vmul.f32 %v71_v18, %v37_v17 }
 0x131   :  { %v85_v19 = vpop.eup %84 }
 0x132   :  { %v38_v21 = vmul.f32 %v85_v19, %v24_v8  ;;  %v55_v24 = vadd.f32 %v72_v22, %v46_v20 }
 0x134   :  { %v47_v23 = vmul.f32 %v71_v18, %v38_v21 }
 0x136   :  { %v56_v25 = vadd.f32 %v72_v22, %v47_v23 }
 0x138   :  { %v80_v26 = vpack.c.bf16 %v56_v25, %v55_v24 }
 0x13a   :  { %81 = vst [vmem:[%s124_s3] sm:$0xff] %v80_v26  }

// kernel: bert_forward.16
= control target key start
LH: loop header
LB: loop body
LE: loop exit
PB: predicated region body
PF: predicated region fallthrough
CT: control target
= control target key end

     0   :  { %v293_v0 = vmov 0.0   ;;  %vm294_vm0 = vmmov 0   ;;  %s372_s1 = inlined_call_operand.vmem [shape: bf16[128,128], index: 1, kind: input, shape index: {}]   ;;  %s373_s0 = inlined_call_operand.vmem [shape: bf16[16,128], index: 0, kind: input, shape index: {}]   ;;  %s374_s3 = inlined_call_operand.vmem [shape: bf16[16,128], index: 3, kind: input, shape index: {}]   ;;  %s375_s2 = inlined_call_operand.vmem [shape: f32[1,128], index: 2, kind: input, shape index: {}]   ;;  %s376_s4 = inlined_call_operand.vmem [shape: f32[1,128], index: 4, kind: input, shape index: {}]   ;;  %s377_s5 = inlined_call_operand.vmem [shape: f32[1,128], index: 5, kind: input, shape index: {}]   ;;  %s378_s6 = inlined_call_operand.vmem [shape: bf16[16,128], index: 6, kind: output, shape index: {}]  }
   0x1   :  { %258 = vmatprep.subr.bf16.mxu0 %v293_v0  ;;  %v280_v1 = vld [vmem:[%s372_s1 + $0x38] sm:$0xff]   ;;  %274 = vmatprep.mubr.msk.bf16.mxu0 %vm294_vm0, %v293_v0  ;;  %v281_v2 = vld [vmem:[%s372_s1 + $0x30] sm:$0xff]   ;;  %v282_v3 = vld [vmem:[%s372_s1 + $0x28] sm:$0xff]  }
   0x2   :  { %259 = vmatpush3.bf16.msra.mxu0 %v280_v1  ;;  %v283_v4 = vld [vmem:[%s372_s1 + $0x20] sm:$0xff]   ;;  %v284_v5 = vld [vmem:[%s372_s1 + $0x18] sm:$0xff]   ;;  %v285_v6 = vld [vmem:[%s372_s1 + $0x10] sm:$0xff]  }
   0x3   :  { %260 = vmatprep.subr.bf16.mxu0 %v293_v0  ;;  %v286_v7 = vld [vmem:[%s372_s1 + $0x8] sm:$0xff]   ;;  %v287_v8 = vld [vmem:[%s372_s1] sm:$0xff]  }
   0x4   :  { %v288_v9 = vld [vmem:[%s373_s0] sm:$0xff]  }
   0x5   :  { %v241_v10 = vld [vmem:[%s374_s3] sm:$0xff]  }
   0x6   :  { %261 = vmatpush3.bf16.msra.mxu0 %v281_v2  ;;  %v233_v11 = vld [vmem:[%s375_s2] ss:$0 sm:$0xff]  ;;  %v242_v12 = vunpack.c.l.bf16 %v241_v10  ;;  %v243_v17 = vunpack.c.h.bf16 %v241_v10 }
   0x7   :  { %262 = vmatprep.subr.bf16.mxu0 %v293_v0  ;;  %v234_v38 = vld [vmem:[%s376_s4] ss:$0 sm:$0xff] }
   0x8   :  { %v235_v42 = vld [vmem:[%s377_s5] ss:$0 sm:$0xff] }
   0xa   :  { %263 = vmatpush3.bf16.msra.mxu0 %v282_v3 }
   0xb   :  { %264 = vmatprep.subr.bf16.mxu0 %v293_v0 }
   0xe   :  { %265 = vmatpush3.bf16.msra.mxu0 %v283_v4 }
   0xf   :  { %266 = vmatprep.subr.bf16.mxu0 %v293_v0 }
  0x12   :  { %267 = vmatpush3.bf16.msra.mxu0 %v284_v5 }
  0x13   :  { %268 = vmatprep.subr.bf16.mxu0 %v293_v0 }
  0x16   :  { %269 = vmatpush3.bf16.msra.mxu0 %v285_v6 }
  0x17   :  { %270 = vmatprep.subr.bf16.mxu0 %v293_v0 }
  0x1a   :  { %271 = vmatpush3.bf16.msra.mxu0 %v286_v7 }
  0x1b   :  { %272 = vmatprep.subr.bf16.mxu0 %v293_v0 }
  0x1e   :  { %273 = vmatpush3.bf16.msra.mxu0 %v287_v8 }
  0x21   :  { %275 = vmatmul.mubr.bf16.vlgmr.msra.gmra.mxu0 %v288_v9 }
  0xe1   :  { %v138_v13 = vpop.f32.mrf.mxu0 }
  0xe2   :  { %v161_v14 = vadd.f32 %v233_v11, %v138_v13 }
  0xe3   :  { %v276_v15 = vpop.f32.mrf.mxu0 }
  0xe4   :  { %v167_v16 = vadd.f32 %v242_v12, %v161_v14 }
  0xe5   :  { %v141_v18 = vpop.f32.mrf.mxu0 }
  0xe6   :  { %v162_v19 = vadd.f32 %v233_v11, %v141_v18  ;;  %169 = vadd.xlane.f32.xlu0 %v167_v16 }
  0xe7   :  { %v277_v20 = vpop.f32.mrf.mxu0 }
  0xe8   :  { %v168_v21 = vadd.f32 %v243_v17, %v162_v19 }
  0xea   :  { %171 = vadd.xlane.f32.xlu0 %v168_v21 }
 0x16f   :  { %v170_v22 = vpop.xlane.xlu0 %169 }
 0x170   :  { %v174_v23 = vmul.f32 0.0078125, %v170_v22 }
 0x172   :  { %v176_v24 = vsub.f32 %v167_v16, %v174_v23 }
 0x173   :  { %v172_v25 = vpop.xlane.xlu0 %171 }
 0x174   :  { %v175_v26 = vmul.f32 0.0078125, %v172_v25  ;;  %v178_v27 = vmul.f32 %v176_v24, %v176_v24 }
 0x176   :  { %v177_v28 = vsub.f32 %v168_v21, %v175_v26  ;;  %180 = vadd.xlane.f32.xlu1 %v178_v27 }
 0x178   :  { %v179_v29 = vmul.f32 %v177_v28, %v177_v28 }
 0x17a   :  { %182 = vadd.xlane.f32.xlu1 %v179_v29 }
 0x1ff   :  { %v181_v30 = vpop.xlane.xlu1 %180 }
 0x200   :  { %v184_v31 = vmul.f32 0.0078125, %v181_v30 }
 0x202   :  { %v186_v32 = vadd.f32 1e-12, %v184_v31 }
 0x203   :  { %v183_v33 = vpop.xlane.xlu1 %182 }
 0x204   :  { %289 = vrsqrt.f32 %v186_v32  ;;  %v185_v34 = vmul.f32 0.0078125, %v183_v33 }
 0x206   :  { %v187_v35 = vadd.f32 1e-12, %v185_v34 }
 0x208   :  { %291 = vrsqrt.f32 %v187_v35 }
 0x211   :  { %v290_v36 = vpop.eup %289 }
 0x212   :  { %v190_v37 = vmul.f32 %v290_v36, %v176_v24 }
 0x214   :  { %v199_v40 = vmul.f32 %v234_v38, %v190_v37 }
 0x215   :  { %v292_v39 = vpop.eup %291 }
 0x216   :  { %v191_v41 = vmul.f32 %v292_v39, %v177_v28  ;;  %v208_v44 = vadd.f32 %v235_v42, %v199_v40 }
 0x218   :  { %v200_v43 = vmul.f32 %v234_v38, %v191_v41 }
 0x21a   :  { %v209_v45 = vadd.f32 %v235_v42, %v200_v43 }
 0x21c   :  { %v247_v46 = vpack.c.bf16 %v209_v45, %v208_v44 }
 0x21e   :  { %248 = vst [vmem:[%s378_s6] sm:$0xff] %v247_v46  }

// kernel: bert_forward.15
= control target key start
LH: loop header
LB: loop body
LE: loop exit
PB: predicated region body
PF: predicated region fallthrough
CT: control target
= control target key end

     0   :  { %s663_s9 = smov 0   ;;  %s665_s10 = smov 0   ;;  %s725_s0 = inlined_call_operand.vmem [shape: bf16[2,8,384], index: 0, kind: input, shape index: {}]   ;;  %s726_s1 = inlined_call_operand.vmem [shape: f32[2,1,8], index: 1, kind: input, shape index: {}]   ;;  %s727_s2 = inlined_call_operand.vmem [shape: bf16[2,8,128], index: 2, kind: output, shape index: {}]  }
   0x1   :  { %s667_s11 = smov 0  }
   0x2 LB: > { %s24_s12 = sadd.s32 1, %s639_s10  ;;  %p537_p0 = scmp.ge.s32.totalorder %s643_s11, 1  ;;  %s643_s11 = sphi %s667_s11, %s12_s11   ;;  %s639_s10 = sphi %s665_s10, %s729_s10   ;;  %s635_s9 = sphi %s663_s9, %s728_s9  }
   0x3   : > { %p26_p1 = scmp.ge.s32.totalorder %s24_s12, 2  ;;  %p141_p2 = scmp.lt.s32.totalorder %s643_s11, 3 }
   0x5   : > { %s731_s12 = smov (%p26_p1, %s24_s12), 0  ;;  %p142_p3 = pnand %p537_p0, %p141_p2 }
   0x6   : > { %p173_p4 = scmp.lt.s32.totalorder (!%p142_p3), %s635_s9, 1  ;;  %s647_s17 = smov (!%p142_p3), 64  }
   0x7   : > { %145 = sbr.rel (%p142_p3) target bundleno = 1061 (0x425), region = 28 }
   0xc   : > { %v645_v0 = vmov 0.0   ;;  %vm646_vm0 = vmmov 0   ;;  %s733_s9 = smov (!%p173_p4, %s635_s9), 1  ;;  %vm197_vm1 = vcmask 523264   ;;  %vm252_vm2 = vcmask 64512  }
   0xd   : > { %558 = vmatprep.subr.bf16.mxu0 %v645_v0  ;;  %560 = vmatprep.mubr.msk.bf16.mxu0 %vm646_vm0, %v645_v0  ;;  %s582_s13 = smul.u32 12, %s733_s9  ;;  %s184_s20 = scalar_lea.vmem %s726_s1, %s733_s9  ;;  %vm269_vm3 = vcmask 1043456  }
   0xe   : > { %564 = vmatprep.subr.bf16.mxu1 %v645_v0  ;;  %566 = vmatprep.mubr.msk.bf16.mxu1 %vm646_vm0, %v645_v0  ;;  %v541_v6 = vld [vmem:[%s184_s20] ss:$0 sm:$0xff]  ;;  %s539_s21 = sshll.u32 %s733_s9, 2 }
   0xf   : > { %s180_s16 = scalar_lea.vmem %s725_s0, %s582_s13  ;;  %s191_s24 = scalar_lea.vmem %s727_s2, %s539_s21 }
  0x10   : > { %v195_v1 = vld [vmem:[%s180_s16 + $0x4] sm:$0xf]  ;;  %v194_v3 = vld [vmem:[%s180_s16] sm:$0xf]  ;;  %v196_v13 = vld [vmem:[%s180_s16 + $0x8] sm:$0xf] }
  0x11   : > { %v202_v2 = vsel %vm197_vm1, %v195_v1, 0  ;;  %v543_v4 = vcombine.low %v194_v3, %v194_v3  ;;  %v271_v14 = vsel %vm269_vm3, %v196_v13, 0  ;;  %v544_v15 = vcombine.low %v195_v1, %v195_v1 }
  0x12   : > { %559 = vmatpush3.bf16.xpose.msra.mxu0 %v202_v2  ;;  %565 = vmatpush3.bf16.msra.mxu1 %v271_v14  ;;  %v546_v16 = vcombine.low %v196_v13, %v196_v13 }
  0x13   : > { %576 = vmatprep.subr.bf16.mxu0 %v645_v0  ;;  %318 = vrot.lane.b32.xlu1 %v543_v4, %s647_s17 }
  0x14   : > { %570 = vmatprep.subr.bf16.mxu1 %v645_v0 }
  0x19   : > { %561 = vmatmul.mubr.msk.bf16.vlgmr.msra.gmra.mxu0 %vm197_vm1, %v194_v3 }
  0x1a   : > { %578 = vmatprep.mubr.msk.bf16.mxu0 %vm646_vm0, %v645_v0 }
  0x85   : > { %v319_v24 = vpop.permute.xlu1 %318 }
  0xd9   : > { %v238_v5 = vpop.f32.mrf.mxu0 }
  0xda   : > { %v244_v7 = vmul.f32 0.125, %v238_v5 }
  0xdb   : > { %v562_v8 = vpop.f32.mrf.mxu0 }
  0xdc   : > { %v251_v9 = vadd.f32 %v541_v6, %v244_v7 }
  0xdd   : > { %v241_v10 = vpop.f32.mrf.mxu0 }
  0xde   : > { %v253_v11 = vsel %vm252_vm2, %v251_v9, -inf }
  0xdf   : > { %254 = vmax.xlane.f32.xlu0 %v253_v11  ;;  %v563_v12 = vpop.f32.mrf.mxu0 }
  0xf5   : > { %323 = vrot.lane.b32.xlu0 %v544_v15, %s647_s17 }
  0xf9   : > { %389 = vrot.lane.b32.xlu0 %v546_v16, %s647_s17 }
 0x168   : > { %v255_v17 = vpop.xlane.xlu0 %254 }
 0x169   : > { %v256_v18 = vsub.f32 %v251_v9, %v255_v17 }
 0x16b   : > { %v257_v19 = vpack.c.bf16 %v256_v18, %v256_v18 }
 0x16c   : > { %v324_v21 = vpop.permute.xlu0 %323 }
 0x16d   : > { %v259_v20 = vmul.bf16 1069105081, %v257_v19  ;;  %v329_v22 = vsel %vm197_vm1, %v324_v21, 0 }
 0x16f   : > { %613 = vpow.bf16 %v259_v20 }
 0x170   : > { %v390_v38 = vpop.permute.xlu0 %389 }
 0x171   : > { %v395_v39 = vsel %vm269_vm3, %v390_v38, 0 }
 0x172   : > { %577 = vmatpush3.bf16.msra.mxu0 %v395_v39 }
 0x17d   : > { %v614_v23 = vpop.eup %613 }
 0x17e   : > { %567 = vmatmul.mubr.msk.bf16.vlgmr.msra.gmra.mxu1 %vm252_vm2, %v614_v23  ;;  %v261_v35 = vunpack.c.l.bf16 %v614_v23 }
 0x17f   : > { %571 = vmatpush3.bf16.xpose.msra.mxu1 %v329_v22  ;;  %572 = vmatprep.mubr.msk.bf16.mxu1 %vm646_vm0, %v645_v0 }
 0x180   : > { %v262_v37 = vsel %vm252_vm2, %v261_v35, 0.0 }
 0x186   : > { %573 = vmatmul.mubr.msk.bf16.vlgmr.msra.gmra.mxu1 %vm197_vm1, %v319_v24 }
 0x23e   : > { %v307_v25 = vpop.f32.mrf.mxu1 }
 0x240   : > { %v568_v26 = vpop.f32.mrf.mxu1 }
 0x242   : > { %v310_v27 = vpop.f32.mrf.mxu1 }
 0x244   : > { %v569_v28 = vpop.f32.mrf.mxu1 }
 0x246   : > { %v365_v29 = vpop.f32.mrf.mxu1 }
 0x247   : > { %v371_v30 = vmul.f32 0.125, %v365_v29 }
 0x248   : > { %v574_v31 = vpop.f32.mrf.mxu1 }
 0x249   : > { %v372_v32 = vadd.f32 %v541_v6, %v371_v30 }
 0x24a   : > { %v368_v33 = vpop.f32.mrf.mxu1 }
 0x24b   : > { %v373_v34 = vsel %vm252_vm2, %v372_v32, -inf }
 0x24c   : > { %374 = vmax.xlane.f32.xlu1 %v373_v34  ;;  %v575_v36 = vpop.f32.mrf.mxu1 }
 0x250   : > { %263 = vadd.xlane.f32.xlu1 %v262_v37 }
 0x2d5   : > { %v375_v40 = vpop.xlane.xlu1 %374 }
 0x2d6   : > { %v376_v41 = vsub.f32 %v372_v32, %v375_v40 }
 0x2d8   : > { %v377_v42 = vpack.c.bf16 %v376_v41, %v376_v41 }
 0x2d9   : > { %v264_v55 = vpop.xlane.xlu1 %263 }
 0x2da   : > { %v379_v43 = vmul.bf16 1069105081, %v377_v42 }
 0x2dc   : > { %615 = vpow.bf16 %v379_v43 }
 0x2ea   : > { %v616_v44 = vpop.eup %615 }
 0x2eb   : > { %579 = vmatmul.mubr.msk.bf16.vlgmr.msra.gmra.mxu0 %vm252_vm2, %v616_v44  ;;  %v381_v45 = vunpack.c.l.bf16 %v616_v44 }
 0x2ed   : > { %v382_v46 = vsel %vm252_vm2, %v381_v45, 0.0 }
 0x2ee   : > { %383 = vadd.xlane.f32.xlu0 %v382_v46 }
 0x377   : > { %v384_v47 = vpop.xlane.xlu0 %383 }
 0x378   : > { %617 = vrcp.f32 %v384_v47 }
 0x379   : > { %619 = vrcp.f32 %v264_v55 }
 0x385   : > { %v618_v48 = vpop.eup %617 }
 0x386   : > { %v620_v56 = vpop.eup %619 }
 0x387   : > { %v313_v57 = vmul.f32 %v620_v56, %v307_v25 }
 0x389   : > { %v314_v58 = vpack.c.bf16 %v313_v57, %v313_v57 }
 0x3ab   : > { %v431_v49 = vpop.f32.mrf.mxu0 }
 0x3ac   : > { %v437_v50 = vmul.f32 %v618_v48, %v431_v49 }
 0x3ad   : > { %v580_v51 = vpop.f32.mrf.mxu0 }
 0x3ae   : > { %v438_v52 = vpack.c.bf16 %v437_v50, %v437_v50 }
 0x3af   : > { %v434_v53 = vpop.f32.mrf.mxu0 }
 0x3b0   : > { %440 = vrot.lane.b32.xlu1 %v438_v52, %s647_s17 }
 0x3b1   : > { %v581_v54 = vpop.f32.mrf.mxu0 }
 0x422   : > { %v441_v59 = vpop.permute.xlu1 %440 }
 0x423   : > { %v444_v60 = vsel %vm197_vm1, %v314_v58, %v441_v59 }
 0x424   : > { %446 = vst [vmem:[%s191_s24] sm:$0xf] %v444_v60 }
 0x425 PF: > { %s12_s11 = sadd.s32 1, %s643_s11   ;;  %s728_s9 = smov %s639_s10 }
 0x426   : > { %p9_p5 = scmp.ge.s32.totalorder %s12_s11, 4   ;;  %s729_s10 = smov %s731_s12 }
 0x428   :  { %11 = sbr.rel (!%p9_p5) target bundleno = 2 (0x2), region = 61 }

// kernel: bert_forward.14
= control target key start
LH: loop header
LB: loop body
LE: loop exit
PB: predicated region body
PF: predicated region fallthrough
CT: control target
= control target key end

     0   :  { %v453_v0 = vmov 0.0   ;;  %vm454_vm0 = vmmov 0   ;;  %v455_v3 = vmov 0   ;;  %v306_v27 = vlaneseq  ;;  %s566_s1 = inlined_call_operand.vmem [shape: bf16[128,384], index: 1, kind: input, shape index: {}]   ;;  %s567_s0 = inlined_call_operand.vmem [shape: bf16[16,128], index: 0, kind: input, shape index: {}]   ;;  %s568_s2 = inlined_call_operand.vmem [shape: f32[1,384], index: 2, kind: input, shape index: {}]   ;;  %s569_s3 = inlined_call_operand.vmem [shape: bf16[16,384], index: 3, kind: output, shape index: {}]  }
   0x1   :  { %397 = vmatprep.subr.bf16.mxu1 %v453_v0  ;;  %v420_v1 = vld [vmem:[%s566_s1 + $0xac] ss:$12 sps:$4 sm:$0xff]   ;;  %413 = vmatprep.mubr.msk.bf16.mxu1 %vm454_vm0, %v453_v0  ;;  %v422_v2 = vld [vmem:[%s566_s1 + $0xb0] ss:$12 sps:$4 sm:$0xff]   ;;  %v423_v4 = vld [vmem:[%s566_s1 + $0xa8] ss:$12 sps:$4 sm:$0xff]  }
   0x2   :  { %231 = vmatprep.mubr.bf16.mxu0 %v455_v3  ;;  %199 = vmatprep.subr.bf16.mxu0 %v420_v1  ;;  %v424_v5 = vld [vmem:[%s566_s1 + $0x94] ss:$12 sps:$4 sm:$0xff]   ;;  %v426_v6 = vld [vmem:[%s566_s1 + $0x98] ss:$12 sps:$4 sm:$0xff]   ;;  %v427_v7 = vld [vmem:[%s566_s1 + $0x90] ss:$12 sps:$4 sm:$0xff]  }
   0x3   :  { %398 = vmatpush3.bf16.msra.mxu1 %v422_v2  ;;  %200 = vmatpush1.bf16.msra.mxu0 %v423_v4  ;;  %v428_v8 = vld [vmem:[%s566_s1 + $0x7c] ss:$12 sps:$4 sm:$0xff]   ;;  %v430_v9 = vld [vmem:[%s566_s1 + $0x80] ss:$12 sps:$4 sm:$0xff]   ;;  %v431_v10 = vld [vmem:[%s566_s1 + $0x78] ss:$12 sps:$4 sm:$0xff]  }
   0x4   :  { %399 = vmatprep.subr.bf16.mxu1 %v453_v0  ;;  %201 = vmatprep.subr.bf16.mxu0 %v424_v5  ;;  %v432_v11 = vld [vmem:[%s566_s1 + $0x64] ss:$12 sps:$4 sm:$0xff]   ;;  %v434_v12 = vld [vmem:[%s566_s1 + $0x68] ss:$12 sps:$4 sm:$0xff]   ;;  %v435_v13 = vld [vmem:[%s566_s1 + $0x60] ss:$12 sps:$4 sm:$0xff]  }
   0x5   :  { %v436_v14 = vld [vmem:[%s566_s1 + $0x4c] ss:$12 sps:$4 sm:$0xff]   ;;  %v438_v15 = vld [vmem:[%s566_s1 + $0x50] ss:$12 sps:$4 sm:$0xff]   ;;  %v439_v16 = vld [vmem:[%s566_s1 + $0x48] ss:$12 sps:$4 sm:$0xff]  }
   0x6   :  { %v440_v17 = vld [vmem:[%s566_s1 + $0x34] ss:$12 sps:$4 sm:$0xff]   ;;  %v442_v18 = vld [vmem:[%s566_s1 + $0x38] ss:$12 sps:$4 sm:$0xff]   ;;  %v443_v19 = vld [vmem:[%s566_s1 + $0x30] ss:$12 sps:$4 sm:$0xff]  }
   0x7   :  { %400 = vmatpush3.bf16.msra.mxu1 %v426_v6  ;;  %202 = vmatpush1.bf16.msra.mxu0 %v427_v7  ;;  %v444_v20 = vld [vmem:[%s566_s1 + $0x1c] ss:$12 sps:$4 sm:$0xff]   ;;  %v446_v21 = vld [vmem:[%s566_s1 + $0x20] ss:$12 sps:$4 sm:$0xff]   ;;  %v447_v22 = vld [vmem:[%s566_s1 + $0x18] ss:$12 sps:$4 sm:$0xff]  }
   0x8   :  { %401 = vmatprep.subr.bf16.mxu1 %v453_v0  ;;  %203 = vmatprep.subr.bf16.mxu0 %v428_v8  ;;  %v448_v23 = vld [vmem:[%s566_s1 + $0x4] ss:$12 sps:$4 sm:$0xff]   ;;  %v450_v24 = vld [vmem:[%s566_s1 + $0x8] ss:$12 sps:$4 sm:$0xff]   ;;  %v451_v25 = vld [vmem:[%s566_s1] ss:$12 sps:$4 sm:$0xff]  }
   0x9   :  { %v452_v26 = vld [vmem:[%s567_s0] sm:$0xff]   ;;  %v307_v28 = vshrl.u32 %v306_v27, 7 }
   0xa   :  { %v304_v30 = vld [vmem:[%s568_s2] sm:$0x7] }
   0xb   :  { %402 = vmatpush3.bf16.msra.mxu1 %v430_v9  ;;  %204 = vmatpush1.bf16.msra.mxu0 %v431_v10  ;;  %v316_v29 = vsub.s32 2, %v307_v28  ;;  %v308_v31 = vsub.s32 0, %v307_v28  ;;  %v312_v32 = vsub.s32 1, %v307_v28 }
   0xc   :  { %403 = vmatprep.subr.bf16.mxu1 %v453_v0  ;;  %205 = vmatprep.subr.bf16.mxu0 %v432_v11 }
   0xd   :  { %v317_v33 = vrot.slane %v304_v30, %v316_v29  ;;  %v309_v35 = vrot.slane %v304_v30, %v308_v31  ;;  %v313_v36 = vrot.slane %v304_v30, %v312_v32 }
   0xf   :  { %404 = vmatpush3.bf16.msra.mxu1 %v434_v12  ;;  %206 = vmatpush1.bf16.msra.mxu0 %v435_v13 }
  0x10   :  { %405 = vmatprep.subr.bf16.mxu1 %v453_v0  ;;  %207 = vmatprep.subr.bf16.mxu0 %v436_v14 }
  0x13   :  { %406 = vmatpush3.bf16.msra.mxu1 %v438_v15  ;;  %208 = vmatpush1.bf16.msra.mxu0 %v439_v16 }
  0x14   :  { %407 = vmatprep.subr.bf16.mxu1 %v453_v0  ;;  %209 = vmatprep.subr.bf16.mxu0 %v440_v17 }
  0x17   :  { %408 = vmatpush3.bf16.msra.mxu1 %v442_v18  ;;  %210 = vmatpush1.bf16.msra.mxu0 %v443_v19 }
  0x18   :  { %409 = vmatprep.subr.bf16.mxu1 %v453_v0  ;;  %211 = vmatprep.subr.bf16.mxu0 %v444_v20 }
  0x1b   :  { %410 = vmatpush3.bf16.msra.mxu1 %v446_v21  ;;  %212 = vmatpush1.bf16.msra.mxu0 %v447_v22 }
  0x1c   :  { %411 = vmatprep.subr.bf16.mxu1 %v453_v0  ;;  %213 = vmatprep.subr.bf16.mxu0 %v448_v23 }
  0x1f   :  { %412 = vmatpush3.bf16.msra.mxu1 %v450_v24  ;;  %214 = vmatpush1.bf16.msra.mxu0 %v451_v25 }
  0x22   :  { %414 = vmatmul.mubr.bf16.vlgmr.msra.gmra.mxu1 %v452_v26  ;;  %232 = vmatmul.mubr.bf16.vlgmr.msra.gmra.mxu0 %v452_v26 }
  0xe2   :  { %v276_v34 = vpop.f32.mrf.mxu1  ;;  %v233_v38 = vpop.f32.mrf.mxu0 }
  0xe3   :  { %v323_v37 = vadd.f32 %v317_v33, %v276_v34  ;;  %v321_v42 = vadd.f32 %v309_v35, %v233_v38 }
  0xe4   :  { %v415_v39 = vpop.f32.mrf.mxu1  ;;  %v235_v41 = vpop.f32.mrf.mxu0 }
  0xe5   :  { %v385_v40 = vpack.c.bf16 %v323_v37, %v323_v37  ;;  %v322_v43 = vadd.f32 %v313_v36, %v235_v41 }
  0xe6   :  { %v279_v44 = vpop.f32.mrf.mxu1  ;;  %v237_v46 = vpop.f32.mrf.mxu0 }
  0xe7   :  { %348 = vst [vmem:[%s569_s3 + $0x8] sm:$0xf] %v385_v40  ;;  %v326_v45 = vadd.f32 %v317_v33, %v279_v44  ;;  %v384_v47 = vpack.c.bf16 %v322_v43, %v321_v42  ;;  %v324_v51 = vadd.f32 %v309_v35, %v237_v46 }
  0xe8   :  { %v416_v48 = vpop.f32.mrf.mxu1  ;;  %v239_v50 = vpop.f32.mrf.mxu0 }
  0xe9   :  { %v387_v49 = vpack.c.bf16 %v326_v45, %v326_v45  ;;  %347 = vst [vmem:[%s569_s3] sm:$0xff] %v384_v47  ;;  %v325_v52 = vadd.f32 %v313_v36, %v239_v50 }
  0xeb   :  { %350 = vst [vmem:[%s569_s3 + $0x14] sm:$0xf] %v387_v49  ;;  %v386_v53 = vpack.c.bf16 %v325_v52, %v324_v51 }
  0xed   :  { %349 = vst [vmem:[%s569_s3 + $0xc] sm:$0xff] %v386_v53 }

// kernel: bert_forward.17
= control target key start
LH: loop header
LB: loop body
LE: loop exit
PB: predicated region body
PF: predicated region fallthrough
CT: control target
= control target key end

     0   :  { %v314_v1 = vmov 0   ;;  %v191_v18 = vlaneseq  ;;  %s395_s1 = inlined_call_operand.vmem [shape: bf16[128,256], index: 1, kind: input, shape index: {}]   ;;  %s396_s0 = inlined_call_operand.vmem [shape: bf16[16,128], index: 0, kind: input, shape index: {}]   ;;  %s397_s2 = inlined_call_operand.vmem [shape: f32[1,256], index: 2, kind: input, shape index: {}]   ;;  %s398_s3 = inlined_call_operand.vmem [shape: bf16[16,256], index: 3, kind: output, shape index: {}]  }
   0x1   :  { %v281_v0 = vld [vmem:[%s395_s1 + $0x74] ss:$8 sps:$4 sm:$0xff]   ;;  %163 = vmatprep.mubr.bf16.mxu0 %v314_v1  ;;  %v283_v2 = vld [vmem:[%s395_s1 + $0x70] ss:$8 sps:$4 sm:$0xff]   ;;  %v284_v3 = vld [vmem:[%s395_s1 + $0x64] ss:$8 sps:$4 sm:$0xff]  }
   0x2   :  { %131 = vmatprep.subr.bf16.mxu0 %v281_v0  ;;  %v286_v4 = vld [vmem:[%s395_s1 + $0x60] ss:$8 sps:$4 sm:$0xff]   ;;  %v287_v5 = vld [vmem:[%s395_s1 + $0x54] ss:$8 sps:$4 sm:$0xff]   ;;  %v289_v6 = vld [vmem:[%s395_s1 + $0x50] ss:$8 sps:$4 sm:$0xff]  }
   0x3   :  { %132 = vmatpush1.bf16.msra.mxu0 %v283_v2  ;;  %v290_v7 = vld [vmem:[%s395_s1 + $0x44] ss:$8 sps:$4 sm:$0xff]   ;;  %v292_v8 = vld [vmem:[%s395_s1 + $0x40] ss:$8 sps:$4 sm:$0xff]   ;;  %v293_v9 = vld [vmem:[%s395_s1 + $0x34] ss:$8 sps:$4 sm:$0xff]  }
   0x4   :  { %133 = vmatprep.subr.bf16.mxu0 %v284_v3  ;;  %v295_v10 = vld [vmem:[%s395_s1 + $0x30] ss:$8 sps:$4 sm:$0xff]   ;;  %v296_v11 = vld [vmem:[%s395_s1 + $0x24] ss:$8 sps:$4 sm:$0xff]   ;;  %v298_v12 = vld [vmem:[%s395_s1 + $0x20] ss:$8 sps:$4 sm:$0xff]  }
   0x5   :  { %v299_v13 = vld [vmem:[%s395_s1 + $0x14] ss:$8 sps:$4 sm:$0xff]   ;;  %v301_v14 = vld [vmem:[%s395_s1 + $0x10] ss:$8 sps:$4 sm:$0xff]   ;;  %v302_v15 = vld [vmem:[%s395_s1 + $0x4] ss:$8 sps:$4 sm:$0xff]  }
   0x6   :  { %v304_v16 = vld [vmem:[%s395_s1] ss:$8 sps:$4 sm:$0xff]   ;;  %v192_v19 = vshrl.u32 %v191_v18, 7 }
   0x7   :  { %134 = vmatpush1.bf16.msra.mxu0 %v286_v4  ;;  %v305_v17 = vld [vmem:[%s396_s0] sm:$0xff]  }
   0x8   :  { %135 = vmatprep.subr.bf16.mxu0 %v287_v5  ;;  %v193_v20 = vsub.s32 0, %v192_v19  ;;  %v189_v21 = vld [vmem:[%s397_s2] sm:$0x3]  ;;  %v197_v22 = vsub.s32 1, %v192_v19 }
   0xa   :  { %v194_v23 = vrot.slane %v189_v21, %v193_v20  ;;  %v198_v24 = vrot.slane %v189_v21, %v197_v22 }
   0xb   :  { %136 = vmatpush1.bf16.msra.mxu0 %v289_v6 }
   0xc   :  { %137 = vmatprep.subr.bf16.mxu0 %v290_v7 }
   0xf   :  { %138 = vmatpush1.bf16.msra.mxu0 %v292_v8 }
  0x10   :  { %139 = vmatprep.subr.bf16.mxu0 %v293_v9 }
  0x13   :  { %140 = vmatpush1.bf16.msra.mxu0 %v295_v10 }
  0x14   :  { %141 = vmatprep.subr.bf16.mxu0 %v296_v11 }
  0x17   :  { %142 = vmatpush1.bf16.msra.mxu0 %v298_v12 }
  0x18   :  { %143 = vmatprep.subr.bf16.mxu0 %v299_v13 }
  0x1b   :  { %144 = vmatpush1.bf16.msra.mxu0 %v301_v14 }
  0x1c   :  { %145 = vmatprep.subr.bf16.mxu0 %v302_v15 }
  0x1f   :  { %146 = vmatpush1.bf16.msra.mxu0 %v304_v16 }
  0x22   :  { %164 = vmatmul.mubr.bf16.vlgmr.msra.gmra.mxu0 %v305_v17 }
  0xe2   :  { %v165_v25 = vpop.f32.mrf.mxu0 }
  0xe3   :  { %v201_v26 = vadd.f32 %v194_v23, %v165_v25 }
  0xe4   :  { %v167_v27 = vpop.f32.mrf.mxu0 }
  0xe5   :  { %v209_v28 = vmul.f32 0.044715, %v201_v26  ;;  %v202_v29 = vadd.f32 %v198_v24, %v167_v27  ;;  %v205_v56 = vmul.f32 0.5, %v201_v26 }
  0xe6   :  { %v169_v30 = vpop.f32.mrf.mxu0 }
  0xe7   :  { %v213_v31 = vmul.f32 %v209_v28, %v201_v26  ;;  %v210_v32 = vmul.f32 0.044715, %v202_v29  ;;  %v203_v33 = vadd.f32 %v194_v23, %v169_v30  ;;  %v206_v57 = vmul.f32 0.5, %v202_v29 }
  0xe8   :  { %v171_v34 = vpop.f32.mrf.mxu0 }
  0xe9   :  { %v217_v35 = vmul.f32 %v213_v31, %v201_v26  ;;  %v214_v36 = vmul.f32 %v210_v32, %v202_v29  ;;  %v211_v37 = vmul.f32 0.044715, %v203_v33  ;;  %v204_v38 = vadd.f32 %v198_v24, %v171_v34 }
  0xea   :  { %v207_v1 = vmul.f32 0.5, %v203_v33 }
  0xeb   :  { %v221_v39 = vadd.f32 %v217_v35, %v201_v26  ;;  %v218_v40 = vmul.f32 %v214_v36, %v202_v29  ;;  %v215_v41 = vmul.f32 %v211_v37, %v203_v33  ;;  %v212_v42 = vmul.f32 0.044715, %v204_v38 }
  0xec   :  { %v208_v2 = vmul.f32 0.5, %v204_v38 }
  0xed   :  { %v225_v43 = vmul.f32 0.7978846, %v221_v39  ;;  %v222_v44 = vadd.f32 %v218_v40, %v202_v29  ;;  %v219_v45 = vmul.f32 %v215_v41, %v203_v33  ;;  %v216_v46 = vmul.f32 %v212_v42, %v204_v38 }
  0xef   :  { %306 = vtanh.f32 %v225_v43  ;;  %v226_v47 = vmul.f32 0.7978846, %v222_v44  ;;  %v223_v48 = vadd.f32 %v219_v45, %v203_v33  ;;  %v220_v49 = vmul.f32 %v216_v46, %v204_v38 }
  0xf1   :  { %308 = vtanh.f32 %v226_v47  ;;  %v227_v50 = vmul.f32 0.7978846, %v223_v48  ;;  %v224_v51 = vadd.f32 %v220_v49, %v204_v38 }
  0xf3   :  { %310 = vtanh.f32 %v227_v50  ;;  %v228_v52 = vmul.f32 0.7978846, %v224_v51 }
  0xf5   :  { %312 = vtanh.f32 %v228_v52 }
  0xfc   :  { %v307_v53 = vpop.eup %306 }
  0xfd   :  { %v233_v54 = vadd.f32 1.0, %v307_v53 }
  0xfe   :  { %v309_v55 = vpop.eup %308 }
  0xff   :  { %v234_v58 = vadd.f32 1.0, %v309_v55  ;;  %v237_v60 = vmul.f32 %v233_v54, %v205_v56 }
 0x100   :  { %v311_v59 = vpop.eup %310 }
 0x101   :  { %v238_v61 = vmul.f32 %v234_v58, %v206_v57  ;;  %v235_v62 = vadd.f32 1.0, %v311_v59 }
 0x102   :  { %v313_v63 = vpop.eup %312 }
 0x103   :  { %v278_v0 = vpack.c.bf16 %v238_v61, %v237_v60  ;;  %v236_v3 = vadd.f32 1.0, %v313_v63  ;;  %v239_v4 = vmul.f32 %v235_v62, %v207_v1 }
 0x105   :  { %253 = vst [vmem:[%s398_s3] sm:$0xff] %v278_v0  ;;  %v240_v5 = vmul.f32 %v236_v3, %v208_v2 }
 0x107   :  { %v279_v6 = vpack.c.bf16 %v240_v5, %v239_v4 }
 0x109   :  { %254 = vst [vmem:[%s398_s3 + $0x8] sm:$0xff] %v279_v6 }

// kernel: bert_forward.24
= control target key start
LH: loop header
LB: loop body
LE: loop exit
PB: predicated region body
PF: predicated region fallthrough
CT: control target
= control target key end

     0   :  { %v197_v0 = vmov 0.0   ;;  %vm198_vm0 = vmmov 0   ;;  %s252_s1 = inlined_call_operand.vmem [shape: bf16[128,128], index: 1, kind: input, shape index: {}]   ;;  %s253_s0 = inlined_call_operand.vmem [shape: bf16[2,128], index: 0, kind: input, shape index: {}]   ;;  %s254_s2 = inlined_call_operand.vmem [shape: f32[1,128], index: 2, kind: input, shape index: {}]   ;;  %s255_s3 = inlined_call_operand.vmem [shape: bf16[2,128], index: 3, kind: output, shape index: {}]  }
   0x1   :  { %165 = vmatprep.subr.bf16.mxu0 %v197_v0  ;;  %19 = vst [vmem:[#allocation2] sm:$0x3] %v197_v0  ;;  %v187_v1 = vld [vmem:[%s252_s1 + $0x38] sm:$0xff]   ;;  %181 = vmatprep.mubr.msk.bf16.mxu0 %vm198_vm0, %v197_v0  ;;  %v188_v2 = vld [vmem:[%s252_s1 + $0x30] sm:$0xff]   ;;  %v189_v3 = vld [vmem:[%s252_s1 + $0x28] sm:$0xff]  }
   0x2   :  { %166 = vmatpush3.bf16.msra.mxu0 %v187_v1  ;;  %v190_v4 = vld [vmem:[%s252_s1 + $0x20] sm:$0xff]   ;;  %v191_v5 = vld [vmem:[%s252_s1 + $0x18] sm:$0xff]   ;;  %v192_v6 = vld [vmem:[%s252_s1 + $0x10] sm:$0xff]  }
   0x3   :  { %167 = vmatprep.subr.bf16.mxu0 %v197_v0  ;;  %v193_v7 = vld [vmem:[%s252_s1 + $0x8] sm:$0xff]   ;;  %v194_v8 = vld [vmem:[%s252_s1] sm:$0xff]  }
   0x4   :  { %v21_v9 = vld [vmem:[%s253_s0] sm:$0x1] }
   0x5   :  { %v155_v16 = vld [vmem:[%s254_s2] ss:$0 sm:$0xff] }
   0x6   :  { %168 = vmatpush3.bf16.msra.mxu0 %v188_v2 }
   0x7   :  { %169 = vmatprep.subr.bf16.mxu0 %v197_v0 }
   0x8   :  { %v20_v10 = vld [vmem:[#allocation2] sm:$0x3] }
   0xa   :  { %170 = vmatpush3.bf16.msra.mxu0 %v189_v3 }
   0xb   :  { %171 = vmatprep.subr.bf16.mxu0 %v197_v0 }
   0xe   :  { %172 = vmatpush3.bf16.msra.mxu0 %v190_v4 }
   0xf   :  { %173 = vmatprep.subr.bf16.mxu0 %v197_v0 }
  0x12   :  { %174 = vmatpush3.bf16.msra.mxu0 %v191_v5 }
  0x13   :  { %175 = vmatprep.subr.bf16.mxu0 %v197_v0 }
  0x16   :  { %176 = vmatpush3.bf16.msra.mxu0 %v192_v6 }
  0x17   :  { %177 = vmatprep.subr.bf16.mxu0 %v197_v0 }
  0x1a   :  { %178 = vmatpush3.bf16.msra.mxu0 %v193_v7 }
  0x1b   :  { %179 = vmatprep.subr.bf16.mxu0 %v197_v0 }
  0x1e   :  { %180 = vmatpush3.bf16.msra.mxu0 %v194_v8 }
  0x21   :  { %182 = vmatmul.mubr.bf16.vlgmr.msra.gmra.mxu0 %v21_v9 }
  0xe1   :  { %v120_v11 = vpop.f32.mrf.mxu0 }
  0xe2   :  { %v126_v12 = vadd.f32 %v120_v11, %v20_v10 }
  0xe3   :  { %v183_v13 = vpop.f32.mrf.mxu0 }
  0xe4   :  { %127 = vst [vmem:[#allocation2] sm:$0x3] %v126_v12 }
  0xe5   :  { %v123_v14 = vpop.f32.mrf.mxu0 }
  0xe7   :  { %v184_v15 = vpop.f32.mrf.mxu0 }
  0xeb   :  { %v131_v17 = vld [vmem:[#allocation2] sm:$0x3] }
  0xec   :  { %v139_v18 = vadd.f32 %v155_v16, %v131_v17 }
  0xee   :  { %195 = vtanh.f32 %v139_v18 }
  0xfb   :  { %v196_v19 = vpop.eup %195 }
  0xfc   :  { %v141_v20 = vpack.c.bf16 %v196_v19, %v196_v19 }
  0xfe   :  { %142 = vst [vmem:[%s255_s3] sm:$0x1] %v141_v20 }

// kernel: bert_forward.18
= control target key start
LH: loop header
LB: loop body
LE: loop exit
PB: predicated region body
PF: predicated region fallthrough
CT: control target
= control target key end

     0   :  { %s475_s1 = inlined_call_operand.vmem [shape: bf16[256,128], index: 1, kind: input, shape index: {}]   ;;  %s476_s0 = inlined_call_operand.vmem [shape: bf16[16,256], index: 0, kind: input, shape index: {}]   ;;  %s477_s3 = inlined_call_operand.vmem [shape: bf16[16,128], index: 3, kind: input, shape index: {}]   ;;  %s478_s2 = inlined_call_operand.vmem [shape: f32[1,128], index: 2, kind: input, shape index: {}]   ;;  %s479_s4 = inlined_call_operand.vmem [shape: f32[1,128], index: 4, kind: input, shape index: {}]   ;;  %s480_s5 = inlined_call_operand.vmem [shape: f32[1,128], index: 5, kind: input, shape index: {}]   ;;  %s481_s6 = inlined_call_operand.vmem [shape: bf16[16,128], index: 6, kind: output, shape index: {}]  }
   0x1   :  { %v348_v0 = vld [vmem:[%s475_s1 + $0x78] sm:$0xff]   ;;  %v350_v2 = vld [vmem:[%s475_s1 + $0x70] sm:$0xff]   ;;  %v352_v4 = vld [vmem:[%s475_s1 + $0x68] sm:$0xff]  }
   0x2   :  { %v349_v1 = vld [vmem:[%s475_s1 + $0x38] sm:$0xff]   ;;  %326 = vmatprep.subr.bf16.mxu0 %v348_v0  ;;  %v351_v3 = vld [vmem:[%s475_s1 + $0x30] sm:$0xff]   ;;  %v353_v5 = vld [vmem:[%s475_s1 + $0x28] sm:$0xff]  }
   0x3   :  { %327 = vmatpush3.bf16.msra.mxu0 %v349_v1  ;;  %v354_v6 = vld [vmem:[%s475_s1 + $0x60] sm:$0xff]   ;;  %v356_v8 = vld [vmem:[%s475_s1 + $0x58] sm:$0xff]   ;;  %v358_v10 = vld [vmem:[%s475_s1 + $0x50] sm:$0xff]  }
   0x4   :  { %328 = vmatprep.subr.bf16.mxu0 %v350_v2  ;;  %v355_v7 = vld [vmem:[%s475_s1 + $0x20] sm:$0xff]   ;;  %v357_v9 = vld [vmem:[%s475_s1 + $0x18] sm:$0xff]   ;;  %v359_v12 = vld [vmem:[%s475_s1 + $0x10] sm:$0xff]  }
   0x5   :  { %v366_v11 = vld [vmem:[%s476_s0 + $0x4] ss:$8 sps:$4 sm:$0xff]   ;;  %v364_v17 = vld [vmem:[%s476_s0] ss:$8 sps:$4 sm:$0xff]  }
   0x6   :  { %204 = vmatprep.mubr.bf16.mxu0 %v366_v11  ;;  %v360_v13 = vld [vmem:[%s475_s1 + $0x48] sm:$0xff]   ;;  %v362_v15 = vld [vmem:[%s475_s1 + $0x40] sm:$0xff]  }
   0x7   :  { %329 = vmatpush3.bf16.msra.mxu0 %v351_v3  ;;  %v361_v14 = vld [vmem:[%s475_s1 + $0x8] sm:$0xff]   ;;  %v363_v16 = vld [vmem:[%s475_s1] sm:$0xff]  }
   0x8   :  { %330 = vmatprep.subr.bf16.mxu0 %v352_v4  ;;  %v318_v19 = vld [vmem:[%s477_s3] sm:$0xff]  }
   0x9   :  { %v310_v21 = vld [vmem:[%s478_s2] ss:$0 sm:$0xff]  ;;  %v319_v23 = vunpack.c.l.bf16 %v318_v19  ;;  %v320_v29 = vunpack.c.h.bf16 %v318_v19 }
   0xa   :  { %v311_v48 = vld [vmem:[%s479_s4] ss:$0 sm:$0xff] }
   0xb   :  { %331 = vmatpush3.bf16.msra.mxu0 %v353_v5  ;;  %v312_v52 = vld [vmem:[%s480_s5] ss:$0 sm:$0xff] }
   0xc   :  { %332 = vmatprep.subr.bf16.mxu0 %v354_v6 }
   0xf   :  { %333 = vmatpush3.bf16.msra.mxu0 %v355_v7 }
  0x10   :  { %334 = vmatprep.subr.bf16.mxu0 %v356_v8 }
  0x13   :  { %335 = vmatpush3.bf16.msra.mxu0 %v357_v9 }
  0x14   :  { %336 = vmatprep.subr.bf16.mxu0 %v358_v10 }
  0x17   :  { %337 = vmatpush3.bf16.msra.mxu0 %v359_v12 }
  0x18   :  { %338 = vmatprep.subr.bf16.mxu0 %v360_v13 }
  0x1b   :  { %339 = vmatpush3.bf16.msra.mxu0 %v361_v14 }
  0x1c   :  { %340 = vmatprep.subr.bf16.mxu0 %v362_v15 }
  0x1f   :  { %341 = vmatpush3.bf16.msra.mxu0 %v363_v16 }
  0x22   :  { %205 = vmatmul.mubr.bf16.vlgmr.msra.gmra.mxu0 %v364_v17 }
  0xe2   :  { %v342_v18 = vpop.f32.mrf.mxu0 }
  0xe4   :  { %v343_v20 = vpop.f32.mrf.mxu0 }
  0xe5   :  { %v344_v22 = vadd.f32 %v343_v20, %v342_v18 }
  0xe6   :  { %v345_v24 = vpop.f32.mrf.mxu0 }
  0xe7   :  { %v229_v25 = vadd.f32 %v344_v22, %v310_v21 }
  0xe8   :  { %v346_v26 = vpop.f32.mrf.mxu0 }
  0xe9   :  { %v347_v27 = vadd.f32 %v346_v26, %v345_v24  ;;  %v235_v28 = vadd.f32 %v319_v23, %v229_v25 }
  0xeb   :  { %v230_v30 = vadd.f32 %v347_v27, %v310_v21  ;;  %237 = vadd.xlane.f32.xlu0 %v235_v28 }
  0xed   :  { %v236_v31 = vadd.f32 %v320_v29, %v230_v30 }
  0xef   :  { %239 = vadd.xlane.f32.xlu0 %v236_v31 }
 0x174   :  { %v238_v32 = vpop.xlane.xlu0 %237 }
 0x175   :  { %v242_v33 = vmul.f32 0.0078125, %v238_v32 }
 0x177   :  { %v244_v34 = vsub.f32 %v235_v28, %v242_v33 }
 0x178   :  { %v240_v35 = vpop.xlane.xlu0 %239 }
 0x179   :  { %v243_v36 = vmul.f32 0.0078125, %v240_v35  ;;  %v246_v37 = vmul.f32 %v244_v34, %v244_v34 }
 0x17b   :  { %v245_v38 = vsub.f32 %v236_v31, %v243_v36  ;;  %248 = vadd.xlane.f32.xlu1 %v246_v37 }
 0x17d   :  { %v247_v39 = vmul.f32 %v245_v38, %v245_v38 }
 0x17f   :  { %250 = vadd.xlane.f32.xlu1 %v247_v39 }
 0x204   :  { %v249_v40 = vpop.xlane.xlu1 %248 }
 0x205   :  { %v252_v41 = vmul.f32 0.0078125, %v249_v40 }
 0x207   :  { %v254_v42 = vadd.f32 1e-12, %v252_v41 }
 0x208   :  { %v251_v43 = vpop.xlane.xlu1 %250 }
 0x209   :  { %367 = vrsqrt.f32 %v254_v42  ;;  %v253_v44 = vmul.f32 0.0078125, %v251_v43 }
 0x20b   :  { %v255_v45 = vadd.f32 1e-12, %v253_v44 }
 0x20d   :  { %369 = vrsqrt.f32 %v255_v45 }
 0x216   :  { %v368_v46 = vpop.eup %367 }
 0x217   :  { %v258_v47 = vmul.f32 %v368_v46, %v244_v34 }
 0x219   :  { %v267_v50 = vmul.f32 %v311_v48, %v258_v47 }
 0x21a   :  { %v370_v49 = vpop.eup %369 }
 0x21b   :  { %v259_v51 = vmul.f32 %v370_v49, %v245_v38  ;;  %v276_v54 = vadd.f32 %v312_v52, %v267_v50 }
 0x21d   :  { %v268_v53 = vmul.f32 %v311_v48, %v259_v51 }
 0x21f   :  { %v277_v55 = vadd.f32 %v312_v52, %v268_v53 }
 0x221   :  { %v324_v56 = vpack.c.bf16 %v277_v55, %v276_v54 }
 0x223   :  { %325 = vst [vmem:[%s481_s6] sm:$0xff] %v324_v56  }

// kernel: bert_forward.25
= control target key start
LH: loop header
LB: loop body
LE: loop exit
PB: predicated region body
PF: predicated region fallthrough
CT: control target
= control target key end

     0   :  { %v229_v1 = vmov 0.0   ;;  %vm230_vm0 = vmmov 0   ;;  %vm20_vm1 = vcmask 17408   ;;  %s288_s0 = inlined_call_operand.vmem [shape: bf16[2,128], index: 0, kind: input, shape index: {}]   ;;  %s289_s1 = inlined_call_operand.vmem [shape: bf16[128,3], index: 1, kind: input, shape index: {}]   ;;  %s290_s2 = inlined_call_operand.vmem [shape: f32[1,3], index: 2, kind: input, shape index: {}]   ;;  %s291_s3 = inlined_call_operand.hbm [shape: f32[2,3], index: 3, kind: output, shape index: {}]  }
   0x1   :  { %v199_v0 = vld [vmem:[%s289_s1 + $0x38] sm:$0xff]   ;;  %176 = vmatprep.subr.bf16.mxu0 %v229_v1  ;;  %v200_v2 = vld [vmem:[%s289_s1 + $0x30] sm:$0xff]   ;;  %192 = vmatprep.mubr.msk.bf16.mxu0 %vm230_vm0, %v229_v1  ;;  %21 = vst.msk [vmem:[#allocation2] sm:$0x3] %vm20_vm1, %v229_v1  ;;  %v201_v3 = vld [vmem:[%s289_s1 + $0x28] sm:$0xff]  }
   0x2   :  { %177 = vmatpush3.bf16.msra.mxu0 %v199_v0 }
   0x3   :  { %178 = vmatprep.subr.bf16.mxu0 %v229_v1 }
   0x6   :  { %179 = vmatpush3.bf16.msra.mxu0 %v200_v2 }
   0x7   :  { %180 = vmatprep.subr.bf16.mxu0 %v229_v1 }
   0x8   :  { %8 = vsyncpa [#allocation4], 0  ;;  %v202_v4 = vld [vmem:[%s289_s1 + $0x20] sm:$0xff]   ;;  %v203_v5 = vld [vmem:[%s289_s1 + $0x18] sm:$0xff]  }
   0x9   :  { %v204_v6 = vld [vmem:[%s289_s1 + $0x10] sm:$0xff]   ;;  %v205_v7 = vld [vmem:[%s289_s1 + $0x8] sm:$0xff]   ;;  %v206_v8 = vld [vmem:[%s289_s1] sm:$0xff]   ;;  %s231_s1 = smov [#allocation3]  }
   0xa   :  { %181 = vmatpush3.bf16.msra.mxu0 %v201_v3  ;;  %v23_v9 = vld [vmem:[%s288_s0] sm:$0x1]  ;;  %s150_s5 = sshll.u32 %s231_s1, 4  ;;  %s151_s5 = int_to_ptr.vmem [resolvable:$true] %s150_s5 }
   0xb   :  { %182 = vmatprep.subr.bf16.mxu0 %v229_v1  ;;  %v22_v10 = vld [vmem:[#allocation2] sm:$0x3]  ;;  %s207_s0 = scalar_lea.vmem %s151_s5, 32  ;;  %p212_p1 = scmp.lt.s32.totalorder %s151_s5, %s151_s5 }
   0xc   :  { %v166_v16 = vld [vmem:[%s290_s2] ss:$0 sm:$0xff]  ;;  %p208_p0 = scmp.ne.s32.totalorder %s151_s5, %s207_s0  ;;  %p213_p2 = scmp.lt.s32.totalorder %s207_s0, %s207_s0 }
   0xe   :  { %183 = vmatpush3.bf16.msra.mxu0 %v202_v4  ;;  %p214_p3 = por %p213_p2, %p212_p1 }
   0xf   :  { %184 = vmatprep.subr.bf16.mxu0 %v229_v1 }
  0x10   :  { %p215_p4 = pnand %p214_p3, %p208_p0 }
  0x12   :  { %185 = vmatpush3.bf16.msra.mxu0 %v203_v5 }
  0x13   :  { %186 = vmatprep.subr.bf16.mxu0 %v229_v1 }
  0x16   :  { %187 = vmatpush3.bf16.msra.mxu0 %v204_v6 }
  0x17   :  { %188 = vmatprep.subr.bf16.mxu0 %v229_v1 }
  0x1a   :  { %189 = vmatpush3.bf16.msra.mxu0 %v205_v7 }
  0x1b   :  { %190 = vmatprep.subr.bf16.mxu0 %v229_v1 }
  0x1e   :  { %191 = vmatpush3.bf16.msra.mxu0 %v206_v8 }
  0x21   :  { %193 = vmatmul.mubr.bf16.vlgmr.msra.gmra.mxu0 %v23_v9 }
  0xe1   :  { %v122_v11 = vpop.f32.mrf.mxu0 }
  0xe2   :  { %v128_v12 = vadd.f32 %v122_v11, %v22_v10 }
  0xe3   :  { %v194_v13 = vpop.f32.mrf.mxu0 }
  0xe4   :  { %130 = vst.msk [vmem:[#allocation2] sm:$0x3] %vm20_vm1, %v128_v12 }
  0xe5   :  { %v125_v14 = vpop.f32.mrf.mxu0 }
  0xe7   :  { %v195_v15 = vpop.f32.mrf.mxu0 }
  0xeb   :  { %v134_v17 = vld [vmem:[#allocation2] sm:$0x3] }
  0xec   :  { %v142_v18 = vadd.f32 %v166_v16, %v134_v17 }
  0xee   :  { %143 = vst.msk [vmem:[#allocation3] sm:$0x3] %vm20_vm1, %v142_v18 }
  0xef   :  { %218 = shalt.err (!%p215_p4)
}
  0xf0   :  { %153 = dma.vmem_to_hbm [thread:$0]  %s151_s5, 32, %s291_s3, [#allocation4]  }
  0xf1   :  { %227 = dma.done.wait [#allocation4], 32  }
  0xf2   :  { %228 = vsyncadd [#allocation4], 4294967264 }
  0xf3   :  { %157 = vsyncpa [#allocation4], 1 }

</bundles_post_ra>
